<compile_context>
chip_gen: v7x
topology: tpu7x:2x2x1
jax: 0.10.0
libtpu: 0.0.40
codegen_flags: <defaults>
</compile_context>

<pallas_src>
import functools

import jax
import jax.numpy as jnp
import numpy as np
from jax.experimental import pallas as pl
from jax.experimental.pallas import tpu as pltpu


# 3x3 taps in (dy, dx) order matching OIHW weight layout: tap k = (dy+1)*3 + (dx+1).
_TAPS = tuple((dy, dx) for dy in (-1, 0, 1) for dx in (-1, 0, 1))


def _cond_pos_kernel(W, C, x_ref, mask_ref, w_ref, b_ref, o_ref, col_ref):
    """One grid step handles a block of whole images (M = bblk*HW token rows).

    x_ref:    (M, C)     input tokens (also used as the residual)
    mask_ref: (M, 9)     0/1 boundary-validity mask per tap (grid-invariant)
    w_ref:    (9*C, C)   conv taps stacked along K: rows (tap*C + cin) (grid-invariant)
    b_ref:    (1, C)     conv bias (grid-invariant)
    o_ref:    (M, C)     output tokens
    col_ref:  (M, 9*C)   im2col VMEM scratch
    """
    M = x_ref.shape[0]
    xv = x_ref[...]                      # (M, C) -- DMA'd once; doubles as residual
    masks = mask_ref[...]                # (M, 9)

    # Build the im2col operand.  For tap (dy, dx) the operand at output row t is
    # the token at t + dy*W + dx of the *same* image (zero outside the image).
    # Rolling over the whole block only wraps at rows the boundary mask zeroes
    # anyway, so no padded image / halo rows are needed.
    for k, (dy, dx) in enumerate(_TAPS):
        off = dy * W + dx
        shifted = xv if off == 0 else pltpu.roll(xv, shift=(-off) % M, axis=0)
        col_ref[:, k * C:(k + 1) * C] = (
            shifted * masks[:, k:k + 1]).astype(col_ref.dtype)

    # Single fat MXU matmul: (M, 9C) x (9C, C), f32 accumulation.
    acc = jnp.dot(col_ref[...], w_ref[...], preferred_element_type=jnp.float32)
    out = acc + b_ref[...].astype(jnp.float32) + xv.astype(jnp.float32)
    o_ref[...] = out.astype(o_ref.dtype)


def _pick_batch_block(B, HW, col_bytes_per_row, *,
                      scratch_budget=6 << 20, max_m=2048):
    """How many whole images each grid step owns.

    Constraints: bblk divides B; M = bblk*HW is a multiple of 8 (sublane
    alignment) unless bblk == B (a full-array block is always legal); the
    (M, 9*C) im2col scratch stays under `scratch_budget`.
    Preference: the largest legal bblk that still leaves >= 2 grid steps (so
    the "parallel" axis can shard across TensorCores on v7x); otherwise the
    largest legal bblk; otherwise the smallest aligned one.
    """
    aligned = [b for b in range(1, B + 1)
               if B % b == 0 and ((b * HW) % 8 == 0 or b == B)]
    fits = [b for b in aligned
            if b * HW * col_bytes_per_row <= scratch_budget and b * HW <= max_m]
    if fits:
        multi = [b for b in fits if B // b >= 2]
        return max(multi) if multi else max(fits)
    return min(aligned)


def cond_positional_pallas(x, weight, bias, *, height_patch, width_patch,
                           compute_dtype=None):
    """x: (B, H*W, C); weight: (C, C, 3, 3) PyTorch OIHW; bias: (C,)."""
    B, HW, C = x.shape
    H, W = height_patch, width_patch
    assert HW == H * W

    cdt = jnp.dtype(compute_dtype) if compute_dtype is not None else x.dtype
    bblk = _pick_batch_block(B, HW, 9 * C * cdt.itemsize)
    M = bblk * HW
    nblk = B // bblk

    # Flat token view; each grid step owns `bblk` complete images.
    x2d = x.reshape(B * HW, C)

    # Conv weights OIHW -> (kh, kw, Cin, Cout) -> (9*Cin, Cout) so all 9 taps
    # contract in one matmul.
    w2d = jnp.transpose(weight, (2, 3, 1, 0)).reshape(9 * C, C).astype(cdt)
    bias2d = bias.reshape(1, C)

    # Precomputed 0/1 boundary masks per tap (same pattern for every image / step).
    t = np.arange(HW)
    yy, xx = t // W, t % W
    mask_np = np.stack(
        [((yy + dy >= 0) & (yy + dy < H) & (xx + dx >= 0) & (xx + dx < W))
         for (dy, dx) in _TAPS], axis=1).astype(np.float32)          # (HW, 9)
    masks = jnp.asarray(np.tile(mask_np, (bblk, 1)), dtype=x.dtype)  # (M, 9)

    kernel = functools.partial(_cond_pos_kernel, W, C)

    itemsize = jnp.dtype(x.dtype).itemsize
    vmem_est = (M * 9 * C * cdt.itemsize          # im2col scratch
                + 2 * 2 * M * C * itemsize        # double-buffered x & out blocks
                + 2 * 9 * C * C * cdt.itemsize    # weights (conservatively x2)
                + 2 * (M * 128 + C) * 4)          # masks (lane-padded) + bias
    vmem_limit = int(min(64 << 20, max(32 << 20, int(vmem_est * 1.4))))

    out2d = pl.pallas_call(
        kernel,
        out_shape=jax.ShapeDtypeStruct((B * HW, C), x.dtype),
        grid_spec=pltpu.PrefetchScalarGridSpec(
            num_scalar_prefetch=0,
            grid=(nblk,),
            in_specs=[
                pl.BlockSpec((M, C), lambda i: (i, 0)),
                # Grid-invariant blocks (constant block index -> fetched once,
                # not re-DMA'd per grid step).
                pl.BlockSpec((M, 9), lambda i: (0, 0)),
                pl.BlockSpec((9 * C, C), lambda i: (0, 0)),
                pl.BlockSpec((1, C), lambda i: (0, 0)),
            ],
            out_specs=pl.BlockSpec((M, C), lambda i: (i, 0)),
            scratch_shapes=[pltpu.VMEM((M, 9 * C), cdt)],
        ),
        compiler_params=pltpu.CompilerParams(
            dimension_semantics=("parallel",),
            vmem_limit_bytes=vmem_limit,
        ),
    )(x2d, masks, w2d, bias2d)

    return out2d.reshape(B, HW, C)


def cond_positional_ref(x, weight, bias, *, height_patch, width_patch):
    """Pure-JAX reference mirroring the PyTorch forward (NCHW conv)."""
    B, HW, C = x.shape
    H, W = height_patch, width_patch
    img = x.reshape(B, H, W, C).transpose(0, 3, 1, 2)  # NCHW
    out = jax.lax.conv_general_dilated(
        img, weight, window_strides=(1, 1), padding="SAME",
        dimension_numbers=("NCHW", "OIHW", "NCHW"),
    )
    out = out + bias[None, :, None, None]
    out = out.transpose(0, 2, 3, 1).reshape(B, HW, C)
    return out + x


if __name__ == "__main__":
    # Small shapes consistent with the module: B=2, h=w=8 patches, dim=128, ks=3.
    B, H, W, C, KS = 2, 8, 8, 128, 3

    key = jax.random.PRNGKey(0)
    kx, kw, kb = jax.random.split(key, 3)
    x = jax.random.normal(kx, (B, H * W, C), dtype=jnp.float32)
    # Deterministic conv parameters (PyTorch Conv2d weight is OIHW = (C, C, ks, ks)).
    weight = jax.random.normal(kw, (C, C, KS, KS), dtype=jnp.float32) * 0.05
    bias = jax.random.normal(kb, (C,), dtype=jnp.float32) * 0.1

    out = cond_positional_pallas(x, weight, bias, height_patch=H, width_patch=W)
    out = jax.block_until_ready(out)

    ref = cond_positional_ref(x, weight, bias, height_patch=H, width_patch=W)
    assert out.shape == (B, H * W, C)
    assert jnp.allclose(out, ref, rtol=1e-4, atol=1e-4), (
        float(jnp.max(jnp.abs(out - ref)))
    )
    print("KERNEL_OK")
</pallas_src>

<mosaic_0001>
module attributes {stable_mosaic.version = 11 : i64} {
  func.func @_cond_pos_kernel(%arg0: i32, %arg1: memref<64x128xf32, #tpu.memory_space<vmem>>, %arg2: memref<64x9xf32, #tpu.memory_space<vmem>>, %arg3: memref<1152x128xf32, #tpu.memory_space<vmem>>, %arg4: memref<1x128xf32, #tpu.memory_space<vmem>>, %arg5: memref<64x128xf32, #tpu.memory_space<vmem>>, %arg6: memref<64x1152xf32, #tpu.memory_space<vmem>>) attributes {dimension_semantics = [#tpu.dimension_semantics<parallel>], iteration_bounds = array<i64: 2>, scalar_prefetch = 0 : i64, scratch_operands = 1 : i64, tpu.core_type = #tpu.core_type<tc>, window_params = [{transform_indices = @transform_0, window_bounds = array<i64: 64, 128>}, {pipeline_mode = #tpu.pipeline_mode<synchronous>, transform_indices = @transform_1, window_bounds = array<i64: 64, 9>}, {pipeline_mode = #tpu.pipeline_mode<synchronous>, transform_indices = @transform_2, window_bounds = array<i64: 1152, 128>}, {pipeline_mode = #tpu.pipeline_mode<synchronous>, transform_indices = @transform_3, window_bounds = array<i64: 1, 128>}, {transform_indices = @transform_4, window_bounds = array<i64: 64, 128>}]} {
    %c0 = arith.constant 0 : index
    %c0_0 = arith.constant 0 : index
    %0 = vector.load %arg1[%c0, %c0_0] : memref<64x128xf32, #tpu.memory_space<vmem>>, vector<64x128xf32>
    %c0_1 = arith.constant 0 : index
    %c0_2 = arith.constant 0 : index
    %1 = vector.load %arg2[%c0_1, %c0_2] : memref<64x9xf32, #tpu.memory_space<vmem>>, vector<64x9xf32>
    %c9_i32 = arith.constant 9 : i32
    %2 = tpu.dynamic_rotate %0 by %c9_i32 dim 0 : vector<64x128xf32>, i32 -> vector<64x128xf32>
    %3 = vector.extract_strided_slice %1 {offsets = [0, 0], sizes = [64, 1], strides = [1, 1]} : vector<64x9xf32> to vector<64x1xf32>
    %4 = vector.broadcast %3 : vector<64x1xf32> to vector<64x128xf32>
    %5 = arith.mulf %2, %4 : vector<64x128xf32>
    %c0_3 = arith.constant 0 : index
    %c0_4 = arith.constant 0 : index
    %6 = vector.load %arg6[%c0_3, %c0_4] : memref<64x1152xf32, #tpu.memory_space<vmem>>, vector<64x128xf32>
    tpu.vector_store %arg6[%c0_3, %c0_4], %5 {strides = array<i32>} : memref<64x1152xf32, #tpu.memory_space<vmem>>, vector<64x128xf32>,
    %c8_i32 = arith.constant 8 : i32
    %7 = tpu.dynamic_rotate %0 by %c8_i32 dim 0 : vector<64x128xf32>, i32 -> vector<64x128xf32>
    %8 = vector.extract_strided_slice %1 {offsets = [0, 1], sizes = [64, 1], strides = [1, 1]} : vector<64x9xf32> to vector<64x1xf32>
    %9 = vector.broadcast %8 : vector<64x1xf32> to vector<64x128xf32>
    %10 = arith.mulf %7, %9 : vector<64x128xf32>
    %c0_5 = arith.constant 0 : index
    %c128 = arith.constant 128 : index
    %11 = vector.load %arg6[%c0_5, %c128] : memref<64x1152xf32, #tpu.memory_space<vmem>>, vector<64x128xf32>
    tpu.vector_store %arg6[%c0_5, %c128], %10 {strides = array<i32>} : memref<64x1152xf32, #tpu.memory_space<vmem>>, vector<64x128xf32>,
    %c7_i32 = arith.constant 7 : i32
    %12 = tpu.dynamic_rotate %0 by %c7_i32 dim 0 : vector<64x128xf32>, i32 -> vector<64x128xf32>
    %13 = vector.extract_strided_slice %1 {offsets = [0, 2], sizes = [64, 1], strides = [1, 1]} : vector<64x9xf32> to vector<64x1xf32>
    %14 = vector.broadcast %13 : vector<64x1xf32> to vector<64x128xf32>
    %15 = arith.mulf %12, %14 : vector<64x128xf32>
    %c0_6 = arith.constant 0 : index
    %c256 = arith.constant 256 : index
    %16 = vector.load %arg6[%c0_6, %c256] : memref<64x1152xf32, #tpu.memory_space<vmem>>, vector<64x128xf32>
    tpu.vector_store %arg6[%c0_6, %c256], %15 {strides = array<i32>} : memref<64x1152xf32, #tpu.memory_space<vmem>>, vector<64x128xf32>,
    %c1_i32 = arith.constant 1 : i32
    %17 = tpu.dynamic_rotate %0 by %c1_i32 dim 0 : vector<64x128xf32>, i32 -> vector<64x128xf32>
    %18 = vector.extract_strided_slice %1 {offsets = [0, 3], sizes = [64, 1], strides = [1, 1]} : vector<64x9xf32> to vector<64x1xf32>
    %19 = vector.broadcast %18 : vector<64x1xf32> to vector<64x128xf32>
    %20 = arith.mulf %17, %19 : vector<64x128xf32>
    %c0_7 = arith.constant 0 : index
    %c384 = arith.constant 384 : index
    %21 = vector.load %arg6[%c0_7, %c384] : memref<64x1152xf32, #tpu.memory_space<vmem>>, vector<64x128xf32>
    tpu.vector_store %arg6[%c0_7, %c384], %20 {strides = array<i32>} : memref<64x1152xf32, #tpu.memory_space<vmem>>, vector<64x128xf32>,
    %22 = vector.extract_strided_slice %1 {offsets = [0, 4], sizes = [64, 1], strides = [1, 1]} : vector<64x9xf32> to vector<64x1xf32>
    %23 = vector.broadcast %22 : vector<64x1xf32> to vector<64x128xf32>
    %24 = arith.mulf %0, %23 : vector<64x128xf32>
    %c0_8 = arith.constant 0 : index
    %c512 = arith.constant 512 : index
    %25 = vector.load %arg6[%c0_8, %c512] : memref<64x1152xf32, #tpu.memory_space<vmem>>, vector<64x128xf32>
    tpu.vector_store %arg6[%c0_8, %c512], %24 {strides = array<i32>} : memref<64x1152xf32, #tpu.memory_space<vmem>>, vector<64x128xf32>,
    %c63_i32 = arith.constant 63 : i32
    %26 = tpu.dynamic_rotate %0 by %c63_i32 dim 0 : vector<64x128xf32>, i32 -> vector<64x128xf32>
    %27 = vector.extract_strided_slice %1 {offsets = [0, 5], sizes = [64, 1], strides = [1, 1]} : vector<64x9xf32> to vector<64x1xf32>
    %28 = vector.broadcast %27 : vector<64x1xf32> to vector<64x128xf32>
    %29 = arith.mulf %26, %28 : vector<64x128xf32>
    %c0_9 = arith.constant 0 : index
    %c640 = arith.constant 640 : index
    %30 = vector.load %arg6[%c0_9, %c640] : memref<64x1152xf32, #tpu.memory_space<vmem>>, vector<64x128xf32>
    tpu.vector_store %arg6[%c0_9, %c640], %29 {strides = array<i32>} : memref<64x1152xf32, #tpu.memory_space<vmem>>, vector<64x128xf32>,
    %c57_i32 = arith.constant 57 : i32
    %31 = tpu.dynamic_rotate %0 by %c57_i32 dim 0 : vector<64x128xf32>, i32 -> vector<64x128xf32>
    %32 = vector.extract_strided_slice %1 {offsets = [0, 6], sizes = [64, 1], strides = [1, 1]} : vector<64x9xf32> to vector<64x1xf32>
    %33 = vector.broadcast %32 : vector<64x1xf32> to vector<64x128xf32>
    %34 = arith.mulf %31, %33 : vector<64x128xf32>
    %c0_10 = arith.constant 0 : index
    %c768 = arith.constant 768 : index
    %35 = vector.load %arg6[%c0_10, %c768] : memref<64x1152xf32, #tpu.memory_space<vmem>>, vector<64x128xf32>
    tpu.vector_store %arg6[%c0_10, %c768], %34 {strides = array<i32>} : memref<64x1152xf32, #tpu.memory_space<vmem>>, vector<64x128xf32>,
    %c56_i32 = arith.constant 56 : i32
    %36 = tpu.dynamic_rotate %0 by %c56_i32 dim 0 : vector<64x128xf32>, i32 -> vector<64x128xf32>
    %37 = vector.extract_strided_slice %1 {offsets = [0, 7], sizes = [64, 1], strides = [1, 1]} : vector<64x9xf32> to vector<64x1xf32>
    %38 = vector.broadcast %37 : vector<64x1xf32> to vector<64x128xf32>
    %39 = arith.mulf %36, %38 : vector<64x128xf32>
    %c0_11 = arith.constant 0 : index
    %c896 = arith.constant 896 : index
    %40 = vector.load %arg6[%c0_11, %c896] : memref<64x1152xf32, #tpu.memory_space<vmem>>, vector<64x128xf32>
    tpu.vector_store %arg6[%c0_11, %c896], %39 {strides = array<i32>} : memref<64x1152xf32, #tpu.memory_space<vmem>>, vector<64x128xf32>,
    %c55_i32 = arith.constant 55 : i32
    %41 = tpu.dynamic_rotate %0 by %c55_i32 dim 0 : vector<64x128xf32>, i32 -> vector<64x128xf32>
    %42 = vector.extract_strided_slice %1 {offsets = [0, 8], sizes = [64, 1], strides = [1, 1]} : vector<64x9xf32> to vector<64x1xf32>
    %43 = vector.broadcast %42 : vector<64x1xf32> to vector<64x128xf32>
    %44 = arith.mulf %41, %43 : vector<64x128xf32>
    %c0_12 = arith.constant 0 : index
    %c1024 = arith.constant 1024 : index
    %45 = vector.load %arg6[%c0_12, %c1024] : memref<64x1152xf32, #tpu.memory_space<vmem>>, vector<64x128xf32>
    tpu.vector_store %arg6[%c0_12, %c1024], %44 {strides = array<i32>} : memref<64x1152xf32, #tpu.memory_space<vmem>>, vector<64x128xf32>,
    %c0_13 = arith.constant 0 : index
    %c0_14 = arith.constant 0 : index
    %46 = vector.load %arg6[%c0_13, %c0_14] : memref<64x1152xf32, #tpu.memory_space<vmem>>, vector<64x1152xf32>
    %c0_15 = arith.constant 0 : index
    %c0_16 = arith.constant 0 : index
    %47 = vector.load %arg3[%c0_15, %c0_16] : memref<1152x128xf32, #tpu.memory_space<vmem>>, vector<1152x128xf32>
    %cst = arith.constant dense<0.000000e+00> : vector<64x128xf32>
    %48 = tpu.matmul %46, %47, %cst {dimension_numbers = #tpu.dot_dimension_numbers<[1], [0], [0], [1], [0, 0, 1, 1], [], []>} : vector<64x1152xf32>, vector<1152x128xf32>, vector<64x128xf32> -> vector<64x128xf32>
    %c0_17 = arith.constant 0 : index
    %c0_18 = arith.constant 0 : index
    %49 = vector.load %arg4[%c0_17, %c0_18] : memref<1x128xf32, #tpu.memory_space<vmem>>, vector<1x128xf32>
    %50 = vector.broadcast %49 : vector<1x128xf32> to vector<64x128xf32>
    %51 = arith.addf %48, %50 : vector<64x128xf32>
    %52 = arith.addf %51, %0 : vector<64x128xf32>
    %c0_19 = arith.constant 0 : index
    %c0_20 = arith.constant 0 : index
    %53 = vector.load %arg5[%c0_19, %c0_20] : memref<64x128xf32, #tpu.memory_space<vmem>>, vector<64x128xf32>
    tpu.vector_store %arg5[%c0_19, %c0_20], %52 {strides = array<i32>} : memref<64x128xf32, #tpu.memory_space<vmem>>, vector<64x128xf32>,
    return
  }
  func.func @transform_0(%arg0: i32) -> (i32, i32) {
    %c0_i32 = arith.constant 0 : i32
    %c0_i32_0 = arith.constant 0 : i32
    return %arg0, %c0_i32 : i32, i32
  }
  func.func @transform_1(%arg0: i32) -> (i32, i32) {
    %c0_i32 = arith.constant 0 : i32
    %c0_i32_0 = arith.constant 0 : i32
    %c0_i32_1 = arith.constant 0 : i32
    return %c0_i32, %c0_i32_0 : i32, i32
  }
  func.func @transform_2(%arg0: i32) -> (i32, i32) {
    %c0_i32 = arith.constant 0 : i32
    %c0_i32_0 = arith.constant 0 : i32
    %c0_i32_1 = arith.constant 0 : i32
    return %c0_i32, %c0_i32_0 : i32, i32
  }
  func.func @transform_3(%arg0: i32) -> (i32, i32) {
    %c0_i32 = arith.constant 0 : i32
    %c0_i32_0 = arith.constant 0 : i32
    %c0_i32_1 = arith.constant 0 : i32
    return %c0_i32, %c0_i32_0 : i32, i32
  }
  func.func @transform_4(%arg0: i32) -> (i32, i32) {
    %c0_i32 = arith.constant 0 : i32
    %c0_i32_0 = arith.constant 0 : i32
    return %arg0, %c0_i32 : i32, i32
  }
}

</mosaic_0001>

<bundles_post_ra>
// kernel: tpu_custom_call.1
= control target key start
LH: loop header
LB: loop body
LE: loop exit
PB: predicated region body
PF: predicated region fallthrough
CT: control target
= control target key end

     0   :  { %9 = vsyncpa [#allocation4], 0  ;;  %s3051_s0 = inlined_call_operand.hbm [shape: f32[128,128], index: 0, kind: input, shape index: {}]   ;;  %s3052_s1 = inlined_call_operand.vmem [shape: f32[64,9], index: 1, kind: input, shape index: {}]   ;;  %s3053_s2 = inlined_call_operand.hbm [shape: f32[1152,128], index: 2, kind: input, shape index: {}]   ;;  %s3054_s3 = inlined_call_operand.vmem [shape: f32[1,128], index: 3, kind: input, shape index: {}]   ;;  %s3055_s4 = inlined_call_operand.hbm [shape: f32[128,128], index: 4, kind: output, shape index: {}]  }
   0x1   :  { %11 = vsyncpa [#allocation4 + $0x1], 0 }
   0x2   :  { %12 = vsyncpa [#allocation7], 0 }
   0x3   :  { %13 = vsyncpa [#allocation5], 0 }
   0x4   :  { %15 = vsyncpa [#allocation5 + $0x1], 0  ;;  %s2374_s15 = smov 0   ;;  %s2376_s16 = smov 0  }
   0x5   :  { %s2378_s17 = smov 0   ;;  %s2380_s18 = smov 0  }
   0x6 LB: > { %s2395_s19 = sadd.s32 4294967295, %s2331_s18   ;;  %s1586_s20 = sadd.s32 4294967294, %s2331_s18   ;;  %s2331_s18 = sphi %s2380_s18, %s3075_s18   ;;  %s2327_s17 = sphi %s2378_s17, %s3074_s17   ;;  %s2323_s16 = sphi %s2376_s16, %s3073_s16   ;;  %s2319_s15 = sphi %s2374_s15, %s3072_s15  }
   0x7   : > { %p41_p0 = scmp.ne.s32.totalorder %s2323_s16, %s2319_s15  ;;  %p3056_p1 = scmp.eq.s32.totalorder %s2395_s19, 0 }
   0x8   : > { %p134_p3 = scmp.eq.s32.totalorder %s1586_s20, 1  ;;  %p1587_p5 = scmp.ge.s32.totalorder %s2331_s18, 1 }
   0x9   : > { %p2404_p4 = por %p3056_p1, %p41_p0  ;;  %p141_p7 = scmp.lt.s32.totalorder %s2331_s18, 3 }
   0xa   : > { %p2409_p6 = por %p134_p3, %p41_p0  ;;  %s2333_s24 = smov [#allocation6]  }
   0xb   : > { %s3059_s21 = scalar_select %p2404_p4, 1, 0 }
   0xc   : > { %s3060_s22 = scalar_select %p2409_p6, 1, 0 }
   0xd   : > { %p2414_p8 = pnand %p1587_p5, %p141_p7  ;;  %s156_s25 = sshll.u32 %s2333_s24, 4  ;;  %s2418_s25 = int_to_ptr.vmem [resolvable:$true] %s156_s25 }
   0xe   : > { %s2430_s27 = sadd.s32 1, %s2331_s18   ;;  %s28_s28 = sadd.s32 1, %s2327_s17 }
   0xf   : > { %s3061_s23 = scalar_select %p2414_p8, 1, 0 }
  0x10   : > { %p2081_p9 = pneg %p2414_p8  ;;  %s25_s29 = ssub.s32 %s2331_s18, %s2430_s27 }
  0x11   : > { %s2203_s6 = scalar_lea.hbm %s3053_s2, 18432 }
  0x12   : > { %p2425_p11 = pnand %p2081_p9, %p3056_p1  ;;  %p2204_p12 = scmp.ne.s32.totalorder %s3053_s2, %s2203_s6 }
  0x13   : > { %p2210_p5 = scmp.lt.u32.totalorder %s2203_s6, %s3053_s2 }
  0x14   : > { %p2205_p13 = pneg %p2425_p11 }
  0x16   : > { %p2206_p0 = pnand %p2205_p13, %p2204_p12 }
  0x18   : > { %p2207_p3 = pneg %p2206_p0 }
  0x1a   : > { %p2212_p7 = pnand %p2210_p5, %p2207_p3 }
  0x1c   : > { %2215 = shalt.err (!%p2212_p7)
}
  0x1d   : > { %s2216_s11 = scalar_lea.vmem %s2418_s25, 18432  ;;  %p2224_p2 = scmp.lt.s32.totalorder %s2418_s25, %s2418_s25 }
  0x1e   : > { %p2217_p9 = scmp.ne.s32.totalorder %s2418_s25, %s2216_s11  ;;  %p2225_p6 = scmp.lt.s32.totalorder %s2216_s11, %s2216_s11 }
  0x20   : > { %p2219_p10 = pnand %p2217_p9, %p2205_p13  ;;  %p2226_p4 = por %p2225_p6, %p2224_p2 }
  0x22   : > { %p2220_p1 = pneg %p2219_p10 }
  0x24   : > { %p2227_p8 = pnand %p2226_p4, %p2220_p1 }
  0x26   : > { %2230 = shalt.err (!%p2227_p8)
}
  0x27   : > { %s2334_s12 = smov 128   ;;  %s2335_s13 = smov 8  }
  0x28   : > { %2084 = dma.hbm_to_vmem [thread:$0]  (!%p2425_p11), %s3053_s2, 18432, %s2418_s25, [#allocation7], %s2334_s12, %s2334_s12, %s2335_s13  }
  0x29   : > { %p26_p1 = scmp.eq.s32.totalorder %s25_s29, 0  ;;  %p35_p2 = scmp.ne.s32.totalorder %s2327_s17, %s2323_s16 }
  0x2a   : > { %p36_p4 = scmp.eq.s32.totalorder %s2331_s18, 0  ;;  %p2094_p6 = scmp.lt.s32.totalorder %s2331_s18, 2 }
  0x2b   : > { %s2464_s24 = scalar_select %p26_p1, %s2327_s17, %s28_s28  }
  0x2c   : > { %p37_p8 = por %p36_p4, %p35_p2  ;;  %p3063_p10 = scmp.eq.s32.totalorder %s2395_s19, 1 }
  0x2d   : > { %s173_s26 = sand.u32 1, %s2327_s17   ;;  %s1603_s5 = sshll.u32 %s2331_s18, 10 }
  0x2e   : > { %p2468_p12 = por %p3063_p10, %p35_p2  ;;  %s1590_s6 = sshll.u32 %s173_s26, 6 }
  0x2f   : > { %s2477_s9 = scalar_lea.hbm %s3051_s0, %s1603_s5  ;;  %s177_s25 = scalar_lea.vmem [#allocation3], %s1590_s6 }
  0x30   : > { %s184_s28 = sshll.u32 %s177_s25, 4  ;;  %p2479_p11 = pnand %p2094_p6, %p37_p8  ;;  %s2483_s28 = int_to_ptr.vmem [resolvable:$true] %s184_s28 }
  0x31   : > { %s2485_s10 = scalar_lea.sflag [#allocation4], %s173_s26  ;;  %s2231_s11 = scalar_lea.hbm %s2477_s9, 1024 }
  0x32   : > { %p2232_p13 = scmp.ne.s32.totalorder %s2477_s9, %s2231_s11  ;;  %p2233_p0 = pneg %p2479_p11 }
  0x33   : > { %s2236_s5 = scalar_lea.hbm %s3051_s0, 2048  ;;  %p2237_p7 = scmp.lt.u32.totalorder %s2477_s9, %s3051_s0 }
  0x34   : > { %p2234_p3 = pnand %p2233_p0, %p2232_p13  ;;  %p2238_p9 = scmp.lt.u32.totalorder %s2236_s5, %s2231_s11 }
  0x35   : > { %p2240_p2 = scmp.lt.u32.totalorder %s2231_s11, %s2477_s9 }
  0x36   : > { %p2235_p5 = pneg %p2234_p3  ;;  %p2239_p1 = por %p2238_p9, %p2237_p7 }
  0x38   : > { %p2241_p4 = por %p2240_p2, %p2239_p1 }
  0x3a   : > { %p2242_p6 = pnand %p2241_p4, %p2235_p5 }
  0x3c   : > { %2245 = shalt.err (!%p2242_p6)
}
  0x3d   : > { %s2246_s26 = scalar_lea.vmem %s2483_s28, 1024  ;;  %s2336_s8 = smov [#allocation3]  }
  0x3e   : > { %p2247_p8 = scmp.ne.s32.totalorder %s2483_s28, %s2246_s26  ;;  %s2251_s25 = sshll.u32 %s2336_s8, 4  ;;  %s2252_s25 = int_to_ptr.vmem [resolvable:$false] %s2251_s25 }
  0x3f   : > { %s2253_s14 = scalar_lea.vmem %s2252_s25, 2048  ;;  %p2254_p3 = scmp.lt.s32.totalorder %s2483_s28, %s2252_s25 }
  0x40   : > { %p2249_p10 = pnand %p2247_p8, %p2233_p0  ;;  %p2255_p7 = scmp.lt.s32.totalorder %s2253_s14, %s2246_s26 }
  0x42   : > { %p2250_p13 = pneg %p2249_p10  ;;  %p2256_p9 = por %p2255_p7, %p2254_p3 }
  0x44   : > { %p2257_p1 = pnand %p2256_p9, %p2250_p13 }
  0x46   : > { %2260 = shalt.err (!%p2257_p1)
}
  0x47   : > { %2088 = dma.hbm_to_vmem [thread:$0]  (!%p2479_p11), %s2477_s9, 1024, %s2483_s28, %s2485_s10, %s2334_s12, %s2334_s12, %s2335_s13  }
  0x48   : > { %p3066_p0 = scmp.ne.s32.totalorder %s3061_s23, 0 }
  0x49   : > { %s2519_s11 = sand.u32 (!%p3066_p0), 1, %s2323_s16   ;;  %p3067_p5 = scmp.ne.s32.totalorder (!%p3066_p0), %s3059_s21, 0 }
  0x4a   : > { %196 = sbr.rel (%p3066_p0) target bundleno = 671 (0x29f), region = 36  ;;  %s1594_s20 = sshll.u32 (!%p3066_p0), %s2519_s11, 6 }
  0x4b   : > { %s199_s5 = scalar_lea.sflag (!%p3066_p0), [#allocation4], %s2519_s11  ;;  %s2525_s29 = scalar_lea.vmem (!%p3066_p0), [#allocation3], %s1594_s20 }
  0x51   : > { %2306 = dma.done.wait (%p3067_p5), %s199_s5, 1024  }
  0x52   : > { %2308 = vsyncadd (%p3067_p5), %s199_s5, 4294966272  ;;  %p3068_p11 = scmp.eq.s32.totalorder %s2395_s19, 0 }
  0x54   : > { %2310 = dma.done.wait (%p3068_p11), [#allocation7], 18432   ;;  %p3069_p2 = pmov %p3068_p11 }
  0x55   : > { %v2337_v0 = vmov 0   ;;  %v2540_v1 = vld [vmem:[%s3052_s1 + $0x10] sm:$0xff]  ;;  %v2545_v2 = vld [vmem:[%s3052_s1] sm:$0xff]  ;;  %v2552_v3 = vld [vmem:[%s3052_s1 + $0x28] sm:$0xff]  ;;  %v2338_v13 = vmov 2   ;;  %v2339_v24 = vmov 3  }
  0x56   : > { %2312 = vsyncadd (%p3069_p2), [#allocation7], 4294948864  ;;  %2149 = vset.pattern.permute.xlu0 %v2337_v0  ;;  %2143 = vset.pattern.permute.xlu1 %v2337_v0  ;;  %v845_v4 = vld [vmem:[#allocation6 + $0x180] sm:$0xff]  ;;  %v846_v5 = vld [vmem:[#allocation6 + $0x188] sm:$0xff]  ;;  %v2340_v28 = vmov 1   ;;  %s2981_s10 = scalar_lea.vmem [#allocation8], %s1594_s20 }
  0x57   : > { %280 = vperm.xlu0 %2149, %v2540_v1   ;;  %270 = vperm.xlu1 %2143, %v2545_v2   ;;  %v829_v6 = vld [vmem:[#allocation6 + $0x100] sm:$0xff]  ;;  %v830_v7 = vld [vmem:[#allocation6 + $0x108] sm:$0xff]  ;;  %v1929_v8 = vpack.c.bf16 %v846_v5, %v845_v4  ;;  %v847_v10 = vld [vmem:[#allocation6 + $0x190] sm:$0xff]  ;;  %s1503_s20 = sshll.u32 %s2981_s10, 4  ;;  %s1604_s6 = sshll.u32 %s2395_s19, 10  ;;  %s2997_s20 = int_to_ptr.vmem [resolvable:$true] %s1503_s20 }
  0x58   : > { %v1931_v9 = vpack.c.bf16 %v830_v7, %v829_v6  ;;  %v848_v11 = vld [vmem:[#allocation6 + $0x198] sm:$0xff]  ;;  %v831_v12 = vld [vmem:[#allocation6 + $0x110] sm:$0xff]  ;;  %v849_v16 = vld [vmem:[#allocation6 + $0x1a0] sm:$0xff]  ;;  %s3004_s8 = scalar_lea.hbm %s3055_s4, %s1604_s6  ;;  %s1490_s19 = scalar_lea.sflag [#allocation5], %s2519_s11 }
  0x59   : > { %v1933_v14 = vpack.c.bf16 %v848_v11, %v847_v10  ;;  %v832_v15 = vld [vmem:[#allocation6 + $0x118] sm:$0xff]  ;;  %v850_v17 = vld [vmem:[#allocation6 + $0x1a8] sm:$0xff]  ;;  %1930 = vmatprep.subr.bf16.mxu1 %v1929_v8  ;;  %v833_v21 = vld [vmem:[#allocation6 + $0x120] sm:$0xff]  ;;  %s2261_s25 = scalar_lea.vmem %s2997_s20, 1024  ;;  %s2346_s14 = smov [#allocation8]  }
  0x5a   : > { %v2560_v18 = vld [vmem:[%s3052_s1 + $0x8] sm:$0xff]  ;;  %1932 = vmatpush3.bf16.msra.mxu1 %v1931_v9  ;;  %v1935_v19 = vpack.c.bf16 %v832_v15, %v831_v12  ;;  %v1937_v20 = vpack.c.bf16 %v850_v17, %v849_v16  ;;  %v813_v23 = vld [vmem:[#allocation6 + $0x80] sm:$0xff]  ;;  %v851_v25 = vld [vmem:[#allocation6 + $0x1b0] sm:$0xff]  ;;  %p2262_p4 = scmp.ne.s32.totalorder %s2997_s20, %s2261_s25  ;;  %s2265_s5 = sshll.u32 %s2346_s14, 4  ;;  %s2266_s5 = int_to_ptr.vmem [resolvable:$false] %s2265_s5 }
  0x5b   : > { %295 = vperm.xlu0 %2149, %v2552_v3   ;;  %2144 = vset.pattern.permute.xlu1 %v2338_v13  ;;  %v834_v22 = vld [vmem:[#allocation6 + $0x128] sm:$0xff]  ;;  %v852_v26 = vld [vmem:[#allocation6 + $0x1b8] sm:$0xff]  ;;  %v797_v30 = vld [vmem:[#allocation6] sm:$0xff]  ;;  %s2267_s23 = scalar_lea.vmem %s2266_s5, 2048  ;;  %p2268_p10 = scmp.lt.s32.totalorder %s2997_s20, %s2266_s5 }
  0x5c   : > { %390 = vperm.xlu1 %2144, %v2545_v2   ;;  %1934 = vmatprep.subr.bf16.mxu1 %v1933_v14  ;;  %v814_v27 = vld [vmem:[#allocation6 + $0x88] sm:$0xff]  ;;  %v1939_v32 = vpack.c.bf16 %v834_v22, %v833_v21  ;;  %v1941_v34 = vpack.c.bf16 %v852_v26, %v851_v25  ;;  %v835_v35 = vld [vmem:[#allocation6 + $0x130] sm:$0xff]  ;;  %v836_v36 = vld [vmem:[#allocation6 + $0x138] sm:$0xff]  ;;  %p2263_p6 = pnand %p2262_p4, %p2468_p12  ;;  %p2269_p13 = scmp.lt.s32.totalorder %s2267_s23, %s2261_s25 }
  0x5d   : > { %v1897_v29 = vpack.c.bf16 %v814_v27, %v813_v23  ;;  %v798_v31 = vld [vmem:[#allocation6 + $0x8] sm:$0xff]  ;;  %v815_v37 = vld [vmem:[#allocation6 + $0x90] sm:$0xff]  ;;  %v853_v38 = vld [vmem:[#allocation6 + $0x1c0] sm:$0xff]  ;;  %v1943_v45 = vpack.c.bf16 %v836_v36, %v835_v35 }
  0x5e   : > { %1936 = vmatpush3.bf16.msra.mxu1 %v1935_v19  ;;  %v1899_v33 = vpack.c.bf16 %v798_v31, %v797_v30  ;;  %v854_v39 = vld [vmem:[#allocation6 + $0x1c8] sm:$0xff]  ;;  %v816_v40 = vld [vmem:[#allocation6 + $0x98] sm:$0xff]  ;;  %v799_v42 = vld [vmem:[#allocation6 + $0x10] sm:$0xff]  ;;  %p2264_p8 = pneg %p2263_p6  ;;  %p2270_p3 = por %p2269_p13, %p2268_p10 }
  0x5f   : > { %2158 = vset.pattern.permute.xlu0 %v2339_v24  ;;  %1938 = vmatprep.subr.bf16.mxu1 %v1937_v20  ;;  %v1901_v41 = vpack.c.bf16 %v816_v40, %v815_v37  ;;  %v800_v43 = vld [vmem:[#allocation6 + $0x18] sm:$0xff]  ;;  %v837_v46 = vld [vmem:[#allocation6 + $0x140] sm:$0xff]  ;;  %v838_v47 = vld [vmem:[#allocation6 + $0x148] sm:$0xff]  ;;  %v1945_v49 = vpack.c.bf16 %v854_v39, %v853_v38 }
  0x60   : > { %438 = vperm.xlu0 %2158, %v2545_v2   ;;  %2145 = vset.pattern.permute.xlu1 %v2340_v28  ;;  %v2571_v44 = vld [vmem:[%s3052_s1 + $0x18] sm:$0xff]  ;;  %v1903_v48 = vpack.c.bf16 %v800_v43, %v799_v42  ;;  %v855_v50 = vld [vmem:[#allocation6 + $0x1d0] sm:$0xff]  ;;  %v817_v51 = vld [vmem:[#allocation6 + $0xa0] sm:$0xff]  ;;  %v1947_v60 = vpack.c.bf16 %v838_v47, %v837_v46  ;;  %p2271_p7 = pnand %p2270_p3, %p2264_p8 }
  0x61   : > { %329 = vperm.xlu1 %2145, %v2560_v18   ;;  %1898 = vmatprep.subr.bf16.mxu0 %v1897_v29  ;;  %v818_v52 = vld [vmem:[#allocation6 + $0xa8] sm:$0xff]  ;;  %v856_v53 = vld [vmem:[#allocation6 + $0x1d8] sm:$0xff]  ;;  %v801_v55 = vld [vmem:[#allocation6 + $0x20] sm:$0xff] }
  0x62   : > { %1900 = vmatpush3.bf16.msra.mxu0 %v1899_v33  ;;  %1940 = vmatpush3.bf16.msra.mxu1 %v1939_v32  ;;  %v1905_v54 = vpack.c.bf16 %v818_v52, %v817_v51  ;;  %v802_v56 = vld [vmem:[#allocation6 + $0x28] sm:$0xff]  ;;  %v819_v58 = vld [vmem:[#allocation6 + $0xb0] sm:$0xff]  ;;  %v820_v61 = vld [vmem:[#allocation6 + $0xb8] sm:$0xff]  ;;  %v1949_v62 = vpack.c.bf16 %v856_v53, %v855_v50  ;;  %v2341_v53 = vmov 7  }
  0x63   : > { %1942 = vmatprep.subr.bf16.mxu1 %v1941_v34  ;;  %1902 = vmatprep.subr.bf16.mxu0 %v1901_v41  ;;  %v1907_v57 = vpack.c.bf16 %v802_v56, %v801_v55  ;;  %v2578_v59 = vld [vmem:[%s3052_s1 + $0x30] sm:$0xff]  ;;  %v840_v4 = vld [vmem:[#allocation6 + $0x158] sm:$0xff]  ;;  %v857_v5 = vld [vmem:[#allocation6 + $0x1e0] sm:$0xff]  ;;  %v1909_v6 = vpack.c.bf16 %v820_v61, %v819_v58  ;;  %v2343_v55 = vmov 6  }
  0x64   : > { %442 = vperm.xlu0 %2158, %v2560_v18   ;;  %v839_v63 = vld [vmem:[#allocation6 + $0x150] sm:$0xff]  ;;  %v858_v7 = vld [vmem:[#allocation6 + $0x1e8] sm:$0xff]  ;;  %v804_v9 = vld [vmem:[#allocation6 + $0x38] sm:$0xff] }
  0x65   : > { %2146 = vset.pattern.permute.xlu1 %v2337_v0  ;;  %v803_v8 = vld [vmem:[#allocation6 + $0x30] sm:$0xff]  ;;  %v821_v10 = vld [vmem:[#allocation6 + $0xc0] sm:$0xff]  ;;  %v822_v11 = vld [vmem:[#allocation6 + $0xc8] sm:$0xff]  ;;  %v1951_v12 = vpack.c.bf16 %v840_v4, %v839_v63  ;;  %v1953_v14 = vpack.c.bf16 %v858_v7, %v857_v5 }
  0x66   : > { %275 = vperm.xlu1 %2146, %v2560_v18   ;;  %1904 = vmatpush3.bf16.msra.mxu0 %v1903_v48  ;;  %v841_v15 = vld [vmem:[#allocation6 + $0x160] sm:$0xff]  ;;  %v842_v16 = vld [vmem:[#allocation6 + $0x168] sm:$0xff]  ;;  %v1911_v17 = vpack.c.bf16 %v804_v9, %v803_v8  ;;  %v859_v19 = vld [vmem:[#allocation6 + $0x1f0] sm:$0xff]  ;;  %v1913_v20 = vpack.c.bf16 %v822_v11, %v821_v10 }
  0x67   : > { %1944 = vmatpush3.bf16.msra.mxu1 %v1943_v45  ;;  %1906 = vmatprep.subr.bf16.mxu0 %v1905_v54  ;;  %v805_v21 = vld [vmem:[#allocation6 + $0x40] sm:$0xff]  ;;  %v806_v22 = vld [vmem:[#allocation6 + $0x48] sm:$0xff]  ;;  %v860_v23 = vld [vmem:[#allocation6 + $0x1f8] sm:$0xff]  ;;  %v1955_v29 = vpack.c.bf16 %v842_v16, %v841_v15  ;;  %v2342_v54 = vmov 5  }
  0x68   : > { %450 = vperm.xlu0 %2158, %v2571_v44   ;;  %1946 = vmatprep.subr.bf16.mxu1 %v1945_v49  ;;  %v823_v25 = vld [vmem:[#allocation6 + $0xd0] sm:$0xff]  ;;  %v824_v26 = vld [vmem:[#allocation6 + $0xd8] sm:$0xff]  ;;  %v2590_v27 = vld [vmem:[%s3052_s1 + $0x20] sm:$0xff]  ;;  %v1915_v30 = vpack.c.bf16 %v806_v22, %v805_v21  ;;  %v1957_v31 = vpack.c.bf16 %v860_v23, %v859_v19 }
  0x69   : > { %v843_v32 = vld [vmem:[#allocation6 + $0x170] sm:$0xff]  ;;  %v844_v33 = vld [vmem:[#allocation6 + $0x178] sm:$0xff]  ;;  %v1917_v34 = vpack.c.bf16 %v824_v26, %v823_v25  ;;  %v825_v37 = vld [vmem:[#allocation6 + $0xe0] sm:$0xff] }
  0x6a   : > { %2147 = vset.pattern.permute.xlu1 %v2340_v28  ;;  %1908 = vmatpush3.bf16.msra.mxu0 %v1907_v57  ;;  %v807_v35 = vld [vmem:[#allocation6 + $0x50] sm:$0xff]  ;;  %v808_v36 = vld [vmem:[#allocation6 + $0x58] sm:$0xff]  ;;  %v826_v38 = vld [vmem:[#allocation6 + $0xe8] sm:$0xff]  ;;  %v1959_v40 = vpack.c.bf16 %v844_v33, %v843_v32 }
  0x6b   : > { %333 = vperm.xlu1 %2147, %v2540_v1   ;;  %1948 = vmatpush3.bf16.msra.mxu1 %v1947_v60  ;;  %v2598_v39 = vld [vmem:[%s3052_s1 + $0x38] sm:$0xff]  ;;  %v1919_v41 = vpack.c.bf16 %v808_v36, %v807_v35  ;;  %v1921_v42 = vpack.c.bf16 %v826_v38, %v825_v37  ;;  %v809_v43 = vld [vmem:[#allocation6 + $0x60] sm:$0xff]  ;;  %v810_v45 = vld [vmem:[#allocation6 + $0x68] sm:$0xff]  ;;  %v2344_v60 = vmov 4  }
  0x6c   : > { %462 = vperm.xlu0 %2158, %v2578_v59   ;;  %1910 = vmatprep.subr.bf16.mxu0 %v1909_v6  ;;  %v827_v46 = vld [vmem:[#allocation6 + $0xf0] sm:$0xff]  ;;  %v828_v47 = vld [vmem:[#allocation6 + $0xf8] sm:$0xff]  ;;  %v1923_v48 = vpack.c.bf16 %v810_v45, %v809_v43  ;;  %v877_v56 = vld [vmem:[#allocation6 + $0x280] sm:$0xff] }
  0x6d   : > { %1950 = vmatprep.subr.bf16.mxu1 %v1949_v62  ;;  %v1925_v49 = vpack.c.bf16 %v828_v47, %v827_v46  ;;  %v811_v50 = vld [vmem:[#allocation6 + $0x70] sm:$0xff]  ;;  %v812_v51 = vld [vmem:[#allocation6 + $0x78] sm:$0xff]  ;;  %v878_v57 = vld [vmem:[#allocation6 + $0x288] sm:$0xff] }
  0x6e   : > { %1912 = vmatpush3.bf16.msra.mxu0 %v1911_v17  ;;  %v1927_v52 = vpack.c.bf16 %v812_v51, %v811_v50  ;;  %v1961_v58 = vpack.c.bf16 %v878_v57, %v877_v56  ;;  %v909_v61 = vld [vmem:[#allocation6 + $0x380] sm:$0xff]  ;;  %v910_v62 = vld [vmem:[#allocation6 + $0x388] sm:$0xff]  ;;  %v2673_v5 = vld [vmem:[%s2525_s29 + $0x38] sm:$0xff] }
  0x6f   : > { %2148 = vset.pattern.permute.xlu1 %v2339_v24  ;;  %1952 = vmatpush3.bf16.msra.mxu1 %v1951_v12  ;;  %v1993_v63 = vpack.c.bf16 %v910_v62, %v909_v61  ;;  %v2668_v4 = vld [vmem:[%s2525_s29] sm:$0xff]  ;;  %v379_v9 = vrot.slane %v2673_v5, 1  ;;  %v256_v10 = vrot.slane %v2673_v5, 7  ;;  %v894_v15 = vld [vmem:[#allocation6 + $0x308] sm:$0xff]  ;;  %v911_v17 = vld [vmem:[#allocation6 + $0x390] sm:$0xff] }
  0x70   : > { %2161 = vset.pattern.permute.xlu0 %v2340_v28  ;;  %446 = vperm.xlu1 %2148, %v2540_v1   ;;  %v249_v6 = vrot.slane %v2668_v4, 7  ;;  %v372_v8 = vrot.slane %v2668_v4, 1  ;;  %v912_v19 = vld [vmem:[#allocation6 + $0x398] sm:$0xff]  ;;  %v2702_v21 = vld [vmem:[%s2525_s29 + $0x8] sm:$0xff]  ;;  %v915_v43 = vld [vmem:[#allocation6 + $0x3b0] sm:$0xff] }
  0x71   : > { %325 = vperm.xlu0 %2161, %v2545_v2   ;;  %1954 = vmatprep.subr.bf16.mxu1 %v1953_v14  ;;  %v893_v14 = vld [vmem:[#allocation6 + $0x300] sm:$0xff]  ;;  %v250_v26 = vrot.slane %v2702_v21, 7  ;;  %v896_v32 = vld [vmem:[#allocation6 + $0x318] sm:$0xff]  ;;  %v914_v33 = vld [vmem:[#allocation6 + $0x3a8] sm:$0xff] }
  0x72   : > { %1914 = vmatprep.subr.bf16.mxu0 %v1913_v20  ;;  %v1995_v25 = vpack.c.bf16 %v894_v15, %v893_v14  ;;  %v916_v45 = vld [vmem:[#allocation6 + $0x3b8] sm:$0xff]  ;;  %v2724_v47 = vld [vmem:[%s2525_s29 + $0x30] sm:$0xff]  ;;  %v917_v56 = vld [vmem:[#allocation6 + $0x3c0] sm:$0xff] }
  0x73   : > { %1956 = vmatpush3.bf16.msra.mxu1 %v1955_v29  ;;  %1916 = vmatpush3.bf16.msra.mxu0 %v1915_v30  ;;  %v1997_v30 = vpack.c.bf16 %v912_v19, %v911_v17  ;;  %v899_v50 = vld [vmem:[#allocation6 + $0x330] sm:$0xff]  ;;  %v900_v51 = vld [vmem:[#allocation6 + $0x338] sm:$0xff]  ;;  %v918_v57 = vld [vmem:[#allocation6 + $0x3c8] sm:$0xff] }
  0x74   : > { %2150 = vset.pattern.permute.xlu1 %v2338_v13  ;;  %1958 = vmatprep.subr.bf16.mxu1 %v1957_v31  ;;  %v895_v31 = vld [vmem:[#allocation6 + $0x310] sm:$0xff]  ;;  %v2007_v62 = vpack.c.bf16 %v900_v51, %v899_v50  ;;  %v862_v14 = vld [vmem:[#allocation6 + $0x208] sm:$0xff]  ;;  %v2752_v51 = vld [vmem:[%s2525_s29 + $0x18] sm:$0xff] }
  0x75   : > { %341 = vperm.xlu0 %2161, %v2590_v27   ;;  %398 = vperm.xlu1 %2150, %v2540_v1   ;;  %v1999_v37 = vpack.c.bf16 %v896_v32, %v895_v31  ;;  %v879_v19 = vld [vmem:[#allocation6 + $0x290] sm:$0xff] }
  0x76   : > { %1918 = vmatprep.subr.bf16.mxu0 %v1917_v34 }
  0x77   : > { %1960 = vmatpush3.bf16.msra.mxu1 %v1959_v40  ;;  %1920 = vmatpush3.bf16.msra.mxu0 %v1919_v41  ;;  %v897_v41 = vld [vmem:[#allocation6 + $0x320] sm:$0xff] }
  0x78   : > { %1922 = vmatprep.subr.bf16.mxu0 %v1921_v42  ;;  %1994 = vmatprep.subr.bf16.mxu1 %v1993_v63  ;;  %v898_v42 = vld [vmem:[#allocation6 + $0x328] sm:$0xff]  ;;  %v2009_v63 = vpack.c.bf16 %v918_v57, %v917_v56  ;;  %v2755_v56 = vld [vmem:[%s2525_s29 + $0x10] sm:$0xff] }
  0x79   : > { %353 = vperm.xlu0 %2161, %v2598_v39   ;;  %2151 = vset.pattern.permute.xlu1 %v2340_v28 }
  0x7a   : > { %337 = vperm.xlu1 %2151, %v2571_v44  }
  0x7b   : > { %1924 = vmatpush3.bf16.msra.mxu0 %v1923_v48  ;;  %v2003_v48 = vpack.c.bf16 %v898_v42, %v897_v41  ;;  %v882_v42 = vld [vmem:[#allocation6 + $0x2a8] sm:$0xff] }
  0x7c   : > { %1926 = vmatprep.subr.bf16.mxu0 %v1925_v49  ;;  %v2005_v49 = vpack.c.bf16 %v916_v45, %v915_v43  ;;  %v921_v45 = vld [vmem:[#allocation6 + $0x3e0] sm:$0xff] }
  0x7d   : > { %2164 = vset.pattern.permute.xlu0 %v2338_v13 }
  0x7e   : > { %394 = vperm.xlu0 %2164, %v2560_v18   ;;  %2152 = vset.pattern.permute.xlu1 %v2337_v0 }
  0x7f   : > { %285 = vperm.xlu1 %2152, %v2571_v44   ;;  %1928 = vmatpush3.bf16.msra.mxu0 %v1927_v52 }
  0x80   : > { %1962 = vmatprep.subr.bf16.mxu0 %v1961_v58  ;;  %v255_v58 = vrot.slane %v2724_v47, 7 }
  0x82   : > { %406 = vperm.xlu0 %2164, %v2590_v27  }
  0x83   : > { %2153 = vset.pattern.permute.xlu1 %v2338_v13 }
  0x84   : > { %402 = vperm.xlu1 %2153, %v2571_v44  }
  0x86   : > { %418 = vperm.xlu0 %2164, %v2598_v39  }
  0x88   : > { %2154 = vset.pattern.permute.xlu1 %v2339_v24 }
  0x89   : > { %454 = vperm.xlu1 %2154, %v2590_v27  }
  0x8a   : > { %2171 = vset.pattern.permute.xlu0 %v2341_v53 }
  0x8b   : > { %634 = vperm.xlu0 %2171, %v2560_v18  }
  0x8d   : > { %2155 = vset.pattern.permute.xlu1 %v2337_v0 }
  0x8e   : > { %290 = vperm.xlu1 %2155, %v2590_v27  }
  0x8f   : > { %2174 = vset.pattern.permute.xlu0 %v2342_v54 }
  0x90   : > { %542 = vperm.xlu0 %2174, %v2540_v1  }
  0x92   : > { %2156 = vset.pattern.permute.xlu1 %v2340_v28 }
  0x93   : > { %345 = vperm.xlu1 %2156, %v2552_v3  }
  0x94   : > { %554 = vperm.xlu0 %2174, %v2552_v3  }
  0x97   : > { %2157 = vset.pattern.permute.xlu1 %v2339_v24 }
  0x98   : > { %458 = vperm.xlu1 %2157, %v2552_v3   ;;  %2183 = vset.pattern.permute.xlu0 %v2343_v55 }
  0x99   : > { %590 = vperm.xlu0 %2183, %v2540_v1  }
  0x9c   : > { %2159 = vset.pattern.permute.xlu1 %v2338_v13 }
  0x9d   : > { %410 = vperm.xlu1 %2159, %v2552_v3   ;;  %602 = vperm.xlu0 %2183, %v2552_v3  }
  0xa1   : > { %2160 = vset.pattern.permute.xlu1 %v2340_v28  ;;  %2186 = vset.pattern.permute.xlu0 %v2344_v60  ;;  %v2345_v28 = vmov 8  }
  0xa2   : > { %349 = vperm.xlu1 %2160, %v2578_v59   ;;  %486 = vperm.xlu0 %2186, %v2545_v2  }
  0xa6   : > { %2162 = vset.pattern.permute.xlu1 %v2337_v0  ;;  %498 = vperm.xlu0 %2186, %v2571_v44  }
  0xa7   : > { %300 = vperm.xlu1 %2162, %v2578_v59  }
  0xaa   : > { %510 = vperm.xlu0 %2186, %v2578_v59  }
  0xab   : > { %2163 = vset.pattern.permute.xlu1 %v2338_v13 }
  0xac   : > { %414 = vperm.xlu1 %2163, %v2578_v59  }
  0xae   : > { %2189 = vset.pattern.permute.xlu0 %v2341_v53 }
  0xaf   : > { %646 = vperm.xlu0 %2189, %v2590_v27  }
  0xb0   : > { %2165 = vset.pattern.permute.xlu1 %v2339_v24 }
  0xb1   : > { %466 = vperm.xlu1 %2165, %v2598_v39  }
  0xb3   : > { %658 = vperm.xlu0 %2189, %v2598_v39  }
  0xb5   : > { %2166 = vset.pattern.permute.xlu1 %v2337_v0  ;;  %v257_v0 = vlaneseq }
  0xb6   : > { %305 = vperm.xlu1 %2166, %v2598_v39  }
  0xb7   : > { %2194 = vset.pattern.permute.xlu0 %v2345_v28 }
  0xb8   : > { %678 = vperm.xlu0 %2194, %v2545_v2  }
  0xba   : > { %2167 = vset.pattern.permute.xlu1 %v2342_v54 }
  0xbb   : > { %534 = vperm.xlu1 %2167, %v2545_v2  }
  0xbc   : > { %698 = vperm.xlu0 %2194, %v2552_v3  }
  0xbf   : > { %2168 = vset.pattern.permute.xlu1 %v2341_v53 }
  0xc0   : > { %630 = vperm.xlu1 %2168, %v2545_v2   ;;  %702 = vperm.xlu0 %2194, %v2578_v59  }
  0xc4   : > { %2169 = vset.pattern.permute.xlu1 %v2343_v55  ;;  %706 = vperm.xlu0 %2194, %v2598_v39  }
  0xc5   : > { %582 = vperm.xlu1 %2169, %v2545_v2   ;;  %v2670_v2 = vshrl.u32 %v257_v0, 7  ;;  %v901_v0 = vld [vmem:[#allocation6 + $0x340] sm:$0xff] }
  0xc7   : > { %vm380_vm0 = vcmp.lt.s32.totalorder %v2670_v2, 7  ;;  %vm259_vm1 = vcmp.lt.s32.totalorder %v2670_v2, 1 }
  0xc8   : > { %v2690_v12 = vsel %vm259_vm1, %v256_v10, %v249_v6  ;;  %v2698_v16 = vsel %vm380_vm0, %v379_v9, %v372_v8  ;;  %v2714_v34 = vsel %vm259_vm1, %v249_v6, %v250_v26  ;;  %v902_v6 = vld [vmem:[#allocation6 + $0x348] sm:$0xff]  ;;  %v2738_v15 = vsel %vm259_vm1, %v255_v58, %v256_v10 }
  0xc9   : > { %2170 = vset.pattern.permute.xlu1 %v2342_v54 }
  0xca   : > { %538 = vperm.xlu1 %2170, %v2560_v18  }
  0xce   : > { %2172 = vset.pattern.permute.xlu1 %v2344_v60 }
  0xcf   : > { %490 = vperm.xlu1 %2172, %v2560_v18  }
  0xd3   : > { %2173 = vset.pattern.permute.xlu1 %v2343_v55 }
  0xd4   : > { %586 = vperm.xlu1 %2173, %v2560_v18  }
  0xd6   : > { %v2663_v13 = vpop.permute.xlu1 %270  ;;  %v2665_v24 = vpop.permute.xlu0 %280 }
  0xd7   : > { %v308_v10 = vmul.f32 %v2663_v13, %v2738_v15 }
  0xd8   : > { %2175 = vset.pattern.permute.xlu1 %v2341_v53 }
  0xd9   : > { %638 = vperm.xlu1 %2175, %v2540_v1  }
  0xda   : > { %v2678_v7 = vpop.permute.xlu0 %295 }
  0xdb   : > { %v391_v11 = vpop.permute.xlu1 %390 }
  0xdc   : > { %v421_v29 = vmul.f32 %v391_v11, %v2698_v16  ;;  %v861_v11 = vld [vmem:[#allocation6 + $0x200] sm:$0xff] }
  0xdd   : > { %2176 = vset.pattern.permute.xlu1 %v2344_v60  ;;  %v1963_v32 = vpack.c.bf16 %v862_v14, %v861_v11 }
  0xde   : > { %494 = vperm.xlu1 %2176, %v2540_v1   ;;  %v913_v1 = vld [vmem:[#allocation6 + $0x3a0] sm:$0xff] }
  0xdf   : > { %v439_v20 = vpop.permute.xlu0 %438  ;;  %v2001_v40 = vpack.c.bf16 %v914_v33, %v913_v1  ;;  %v903_v1 = vld [vmem:[#allocation6 + $0x350] sm:$0xff]  ;;  %v904_v33 = vld [vmem:[#allocation6 + $0x358] sm:$0xff] }
  0xe0   : > { %v2704_v22 = vpop.permute.xlu1 %329  ;;  %v469_v23 = vmul.f32 %v439_v20, %v2690_v12  ;;  %v880_v20 = vld [vmem:[#allocation6 + $0x298] sm:$0xff]  ;;  %v2015_v50 = vpack.c.bf16 %v904_v33, %v903_v1 }
  0xe1   : > { %v357_v41 = vmul.f32 %v2704_v22, %v2668_v4 }
  0xe2   : > { %2177 = vset.pattern.permute.xlu1 %v2342_v54  ;;  %1117 = vmatprep.mubr.f32.mxu1 %v469_v23 }
  0xe3   : > { %546 = vperm.xlu1 %2177, %v2571_v44   ;;  %1118 = vmatmul.mubr.f32.vlgmr.msra.gmra.mrb[0].mxu1 %v421_v29  ;;  %v443_v35 = vpop.permute.xlu0 %442  ;;  %v919_v29 = vld [vmem:[#allocation6 + $0x3d0] sm:$0xff] }
  0xe4   : > { %v470_v36 = vmul.f32 %v443_v35, %v2714_v34  ;;  %1996 = vmatpush3.bf16.msra.mxu1 %v1995_v25  ;;  %v2011_v25 = vpack.c.bf16 %v902_v6, %v901_v0  ;;  %v1965_v35 = vpack.c.bf16 %v880_v20, %v879_v19  ;;  %v866_v0 = vld [vmem:[#allocation6 + $0x228] sm:$0xff]  ;;  %v883_v6 = vld [vmem:[#allocation6 + $0x2b0] sm:$0xff]  ;;  %v884_v19 = vld [vmem:[#allocation6 + $0x2b8] sm:$0xff] }
  0xe5   : > { %v2718_v38 = vpop.permute.xlu1 %275  ;;  %1998 = vmatprep.subr.bf16.mxu1 %v1997_v30  ;;  %v920_v30 = vld [vmem:[#allocation6 + $0x3d8] sm:$0xff]  ;;  %v905_v20 = vld [vmem:[#allocation6 + $0x360] sm:$0xff] }
  0xe6   : > { %1122 = vmatprep.mubr.f32.mxu1 %v470_v36  ;;  %v863_v36 = vld [vmem:[#allocation6 + $0x210] sm:$0xff]  ;;  %v2013_v43 = vpack.c.bf16 %v920_v30, %v919_v29  ;;  %v309_v22 = vmul.f32 %v2718_v38, %v2690_v12  ;;  %v924_v30 = vld [vmem:[#allocation6 + $0x3f8] sm:$0xff] }
  0xe7   : > { %2178 = vset.pattern.permute.xlu1 %v2341_v53  ;;  %v2721_v46 = vpop.permute.xlu0 %450  ;;  %v923_v29 = vld [vmem:[#allocation6 + $0x3f0] sm:$0xff] }
  0xe8   : > { %642 = vperm.xlu1 %2178, %v2571_v44   ;;  %2000 = vmatpush3.bf16.msra.mxu1 %v1999_v37  ;;  %v864_v37 = vld [vmem:[#allocation6 + $0x218] sm:$0xff] }
  0xe9   : > { %2002 = vmatprep.subr.bf16.mxu1 %v2001_v40  ;;  %v881_v40 = vld [vmem:[#allocation6 + $0x2a0] sm:$0xff]  ;;  %v1967_v57 = vpack.c.bf16 %v864_v37, %v863_v36 }
  0xea   : > { %v334_v52 = vpop.permute.xlu1 %333 }
  0xeb   : > { %v2728_v61 = vpop.permute.xlu0 %462  ;;  %v358_v14 = vmul.f32 %v334_v52, %v2702_v21  ;;  %v373_v52 = vrot.slane %v2702_v21, 1 }
  0xec   : > { %2179 = vset.pattern.permute.xlu1 %v2343_v55  ;;  %2004 = vmatpush3.bf16.msra.mxu1 %v2003_v48  ;;  %v922_v48 = vld [vmem:[#allocation6 + $0x3e8] sm:$0xff] }
  0xed   : > { %594 = vperm.xlu1 %2179, %v2571_v44   ;;  %2006 = vmatprep.subr.bf16.mxu1 %v2005_v49  ;;  %v2017_v11 = vpack.c.bf16 %v922_v48, %v921_v45  ;;  %v2776_v37 = vsel %vm380_vm0, %v372_v8, %v373_v52  ;;  %v908_v45 = vld [vmem:[#allocation6 + $0x378] sm:$0xff] }
  0xef   : > { %v2740_v17 = vpop.permute.xlu1 %446 }
  0xf0   : > { %v326_v23 = vpop.permute.xlu0 %325  ;;  %2008 = vmatpush3.bf16.msra.mxu1 %v2007_v62  ;;  %v1969_v62 = vpack.c.bf16 %v882_v42, %v881_v40  ;;  %v867_v40 = vld [vmem:[#allocation6 + $0x230] sm:$0xff]  ;;  %v868_v42 = vld [vmem:[#allocation6 + $0x238] sm:$0xff] }
  0xf1   : > { %2180 = vset.pattern.permute.xlu1 %v2342_v54  ;;  %v356_v31 = vmul.f32 %v326_v23, %v2673_v5  ;;  %2010 = vmatprep.subr.bf16.mxu1 %v2009_v63  ;;  %v865_v63 = vld [vmem:[#allocation6 + $0x220] sm:$0xff]  ;;  %v906_v23 = vld [vmem:[#allocation6 + $0x368] sm:$0xff] }
  0xf2   : > { %550 = vperm.xlu1 %2180, %v2590_v27   ;;  %v1971_v33 = vpack.c.bf16 %v866_v0, %v865_v63  ;;  %v2019_v36 = vpack.c.bf16 %v906_v23, %v905_v20 }
  0xf3   : > { %1012 = vmatprep.mubr.f32.mxu0 %v356_v31  ;;  %v252_v31 = vrot.slane %v2752_v51, 7 }
  0xf4   : > { %v2749_v49 = vpop.permute.xlu1 %398  ;;  %1013 = vmatmul.mubr.f32.vlgmr.msra.gmra.mrb[0].mxu0 %v308_v10  ;;  %v342_v13 = vpop.permute.xlu0 %341  ;;  %2012 = vmatpush3.bf16.msra.mxu1 %v2011_v25  ;;  %v310_v25 = vmul.f32 %v2665_v24, %v2714_v34  ;;  %v374_v10 = vrot.slane %v2755_v56, 1 }
  0xf5   : > { %1017 = vmatprep.mubr.f32.mxu0 %v357_v41  ;;  %1964 = vmatpush3.bf16.msra.mxu0 %v1963_v32  ;;  %v251_v32 = vrot.slane %v2755_v56, 7  ;;  %v2021_v41 = vpack.c.bf16 %v924_v30, %v923_v29  ;;  %v360_v63 = vmul.f32 %v342_v13, %v2752_v51  ;;  %v870_v29 = vld [vmem:[#allocation6 + $0x248] sm:$0xff] }
  0xf6   : > { %2181 = vset.pattern.permute.xlu1 %v2344_v60  ;;  %1966 = vmatprep.subr.bf16.mxu0 %v1965_v35  ;;  %v1973_v35 = vpack.c.bf16 %v884_v19, %v883_v6  ;;  %v1975_v19 = vpack.c.bf16 %v868_v42, %v867_v40  ;;  %v872_v42 = vld [vmem:[#allocation6 + $0x258] sm:$0xff] }
  0xf7   : > { %502 = vperm.xlu1 %2181, %v2590_v27   ;;  %2014 = vmatprep.subr.bf16.mxu1 %v2013_v43  ;;  %v907_v43 = vld [vmem:[#allocation6 + $0x370] sm:$0xff]  ;;  %v2783_v48 = vsel %vm259_vm1, %v251_v32, %v252_v31  ;;  %v2789_v8 = vsel %vm259_vm1, %v250_v26, %v251_v32 }
  0xf8   : > { %1018 = vmatmul.mubr.f32.gmra.mrb[2].mxu0 %v309_v22  ;;  %v2764_v38 = vpop.permute.xlu0 %353  ;;  %2016 = vmatpush3.bf16.msra.mxu1 %v2015_v50  ;;  %v886_v22 = vld [vmem:[#allocation6 + $0x2c8] sm:$0xff]  ;;  %v2023_v20 = vpack.c.bf16 %v908_v45, %v907_v43  ;;  %v471_v23 = vmul.f32 %v2740_v17, %v2789_v8  ;;  %v472_v30 = vmul.f32 %v2721_v46, %v2783_v48  ;;  %v889_v45 = vld [vmem:[#allocation6 + $0x2e0] sm:$0xff] }
  0xf9   : > { %v338_v1 = vpop.permute.xlu1 %337  ;;  %1022 = vmatprep.mubr.f32.mxu0 %v358_v14  ;;  %1968 = vmatpush3.bf16.msra.mxu0 %v1967_v57  ;;  %v885_v57 = vld [vmem:[#allocation6 + $0x2c0] sm:$0xff]  ;;  %v375_v14 = vrot.slane %v2752_v51, 1 }
  0xfa   : > { %v359_v24 = vmul.f32 %v338_v1, %v2755_v56  ;;  %1970 = vmatprep.subr.bf16.mxu0 %v1969_v62  ;;  %2018 = vmatprep.subr.bf16.mxu1 %v2017_v11  ;;  %v2793_v62 = vsel %vm380_vm0, %v373_v52, %v374_v10  ;;  %v2798_v11 = vld [vmem:[%s2525_s29 + $0x20] sm:$0xff]  ;;  %v1977_v13 = vpack.c.bf16 %v886_v22, %v885_v57  ;;  %v887_v52 = vld [vmem:[#allocation6 + $0x2d0] sm:$0xff]  ;;  %v888_v1 = vld [vmem:[#allocation6 + $0x2d8] sm:$0xff] }
  0xfb   : > { %2182 = vset.pattern.permute.xlu1 %v2343_v55  ;;  %v376_v32 = vrot.slane %v2798_v11, 1  ;;  %v423_v17 = vmul.f32 %v2749_v49, %v2793_v62 }
  0xfc   : > { %598 = vperm.xlu1 %2182, %v2590_v27   ;;  %1023 = vmatmul.mubr.f32.gmra.mrb[4].mxu0 %v310_v25  ;;  %v869_v25 = vld [vmem:[#allocation6 + $0x240] sm:$0xff] }
  0xfd   : > { %v395_v50 = vpop.permute.xlu0 %394  ;;  %1027 = vmatprep.mubr.f32.mxu0 %v359_v24  ;;  %1972 = vmatpush3.bf16.msra.mxu0 %v1971_v33  ;;  %v253_v33 = vrot.slane %v2798_v11, 7  ;;  %v1979_v46 = vpack.c.bf16 %v870_v29, %v869_v25  ;;  %v2821_v49 = vsel %vm380_vm0, %v375_v14, %v376_v32  ;;  %v2841_v29 = vld [vmem:[%s2525_s29 + $0x28] sm:$0xff] }
  0xfe   : > { %v422_v0 = vmul.f32 %v395_v50, %v2776_v37  ;;  %v286_v6 = vpop.permute.xlu1 %285  ;;  %1974 = vmatprep.subr.bf16.mxu0 %v1973_v35  ;;  %2020 = vmatpush3.bf16.msra.mxu1 %v2019_v36  ;;  %v2814_v35 = vsel %vm380_vm0, %v374_v10, %v375_v14  ;;  %v1981_v36 = vpack.c.bf16 %v888_v1, %v887_v52  ;;  %v890_v50 = vld [vmem:[#allocation6 + $0x2e8] sm:$0xff]  ;;  %v925_v14 = vld [vmem:[#allocation6 + $0x400] sm:$0xff]  ;;  %v875_v1 = vld [vmem:[#allocation6 + $0x270] sm:$0xff] }
  0xff   : > { %v311_v26 = vmul.f32 %v286_v6, %v2789_v8  ;;  %2022 = vmatprep.subr.bf16.mxu1 %v2021_v41  ;;  %v871_v41 = vld [vmem:[#allocation6 + $0x250] sm:$0xff]  ;;  %v2829_v10 = vsel %vm259_vm1, %v252_v31, %v253_v33  ;;  %v1985_v6 = vpack.c.bf16 %v890_v50, %v889_v45  ;;  %v874_v31 = vld [vmem:[#allocation6 + $0x268] sm:$0xff] }
 0x100   : > { %2184 = vset.pattern.permute.xlu1 %v2341_v53  ;;  %1123 = vmatmul.mubr.f32.gmra.mrb[2].mxu1 %v422_v0 }
 0x101   : > { %650 = vperm.xlu1 %2184, %v2552_v3   ;;  %1028 = vmatmul.mubr.f32.gmra.mrb[6].mxu0 %v311_v26  ;;  %v407_v40 = vpop.permute.xlu0 %406  ;;  %v873_v26 = vld [vmem:[#allocation6 + $0x260] sm:$0xff] }
 0x102   : > { %1127 = vmatprep.mubr.f32.mxu1 %v471_v23  ;;  %1032 = vmatprep.mubr.f32.mxu0 %v360_v63  ;;  %v425_v22 = vmul.f32 %v407_v40, %v2821_v49  ;;  %v1983_v63 = vpack.c.bf16 %v872_v42, %v871_v41  ;;  %v1987_v25 = vpack.c.bf16 %v874_v31, %v873_v26 }
 0x103   : > { %v403_v24 = vpop.permute.xlu1 %402  ;;  %1976 = vmatpush3.bf16.msra.mxu0 %v1975_v19  ;;  %2024 = vmatpush3.bf16.msra.mxu1 %v2023_v20  ;;  %v926_v19 = vld [vmem:[#allocation6 + $0x408] sm:$0xff]  ;;  %v892_v20 = vld [vmem:[#allocation6 + $0x2f8] sm:$0xff] }
 0x104   : > { %1128 = vmatmul.mubr.f32.gmra.mrb[4].mxu1 %v423_v17  ;;  %1978 = vmatprep.subr.bf16.mxu0 %v1977_v13  ;;  %v424_v43 = vmul.f32 %v403_v24, %v2814_v35  ;;  %v2837_v23 = vpack.c.bf16 %v926_v19, %v925_v14  ;;  %v876_v17 = vld [vmem:[#allocation6 + $0x278] sm:$0xff]  ;;  %v254_v24 = vrot.slane %v2841_v29, 7 }
 0x105   : > { %2185 = vset.pattern.permute.xlu1 %v2344_v60  ;;  %1132 = vmatprep.mubr.f32.mxu1 %v472_v30  ;;  %v419_v41 = vpop.permute.xlu0 %418  ;;  %v1991_v42 = vpack.c.bf16 %v876_v17, %v875_v1  ;;  %v928_v1 = vld [vmem:[#allocation6 + $0x418] sm:$0xff] }
 0x106   : > { %506 = vperm.xlu1 %2185, %v2552_v3   ;;  %v891_v3 = vld [vmem:[#allocation6 + $0x2f0] sm:$0xff]  ;;  %2057 = vmatprep.subr.bf16.mxu1 %v2837_v23 }
 0x107   : > { %1980 = vmatpush3.bf16.msra.mxu0 %v1979_v46  ;;  %v1989_v52 = vpack.c.bf16 %v892_v20, %v891_v3  ;;  %v313_v46 = vmul.f32 %v2678_v7, %v2829_v10  ;;  %v2196_v3 = vld [vmem:[%s3052_s1 + $0x10] sm:$0xff] }
 0x108   : > { %v455_v57 = vpop.permute.xlu1 %454  ;;  %1133 = vmatmul.mubr.f32.gmra.mrb[6].mxu1 %v424_v43  ;;  %1982 = vmatprep.subr.bf16.mxu0 %v1981_v36  ;;  %v377_v43 = vrot.slane %v2841_v29, 1 }
 0x109   : > { %v473_v0 = vmul.f32 %v455_v57, %v2829_v10 }
 0x10a   : > { %2187 = vset.pattern.permute.xlu1 %v2342_v54  ;;  %v2868_v50 = vpop.permute.xlu0 %634 }
 0x10b   : > { %558 = vperm.xlu1 %2187, %v2578_v59   ;;  %1137 = vmatprep.mubr.f32.mxu1 %v473_v0 }
 0x10c   : > { %1138 = vmatmul.mubr.f32.gmra.mrb[8].mxu1 %v425_v22  ;;  %1984 = vmatpush3.bf16.msra.mxu0 %v1983_v63 }
 0x10d   : > { %v291_v13 = vpop.permute.xlu1 %290  ;;  %1986 = vmatprep.subr.bf16.mxu0 %v1985_v6 }
 0x10e   : > { %v312_v30 = vmul.f32 %v291_v13, %v2783_v48 }
 0x10f   : > { %2188 = vset.pattern.permute.xlu1 %v2341_v53  ;;  %v2856_v53 = vsel %vm259_vm1, %v253_v33, %v254_v24  ;;  %v2875_v33 = vsel %vm380_vm0, %v376_v32, %v377_v43 }
 0x110   : > { %654 = vperm.xlu1 %2188, %v2578_v59   ;;  %1033 = vmatmul.mubr.f32.gmra.mrb[8].mxu0 %v312_v30 }
 0x111   : > { %1988 = vmatpush3.bf16.msra.mxu0 %v1987_v25 }
 0x112   : > { %v346_v36 = vpop.permute.xlu1 %345  ;;  %1990 = vmatprep.subr.bf16.mxu0 %v1989_v52  ;;  %v927_v52 = vld [vmem:[#allocation6 + $0x410] sm:$0xff] }
 0x113   : > { %v361_v40 = vmul.f32 %v346_v36, %v2798_v11  ;;  %v2029_v17 = vpack.c.bf16 %v928_v1, %v927_v52 }
 0x114   : > { %2190 = vset.pattern.permute.xlu1 %v2343_v55 }
 0x115   : > { %606 = vperm.xlu1 %2190, %v2578_v59   ;;  %1037 = vmatprep.mubr.f32.mxu0 %v361_v40  ;;  %v2865_v59 = vsel %vm259_vm1, %v254_v24, %v255_v58 }
 0x116   : > { %1038 = vmatmul.mubr.f32.gmra.mrb[10].mxu0 %v313_v46  ;;  %v475_v57 = vmul.f32 %v2728_v61, %v2865_v59  ;;  %v378_v61 = vrot.slane %v2724_v47, 1  ;;  %v929_v46 = vld [vmem:[#allocation6 + $0x420] sm:$0xff] }
 0x117   : > { %v459_v7 = vpop.permute.xlu1 %458  ;;  %1992 = vmatpush3.bf16.msra.mxu0 %v1991_v42 }
 0x118   : > { %v474_v45 = vmul.f32 %v459_v7, %v2856_v53  ;;  %2026 = vmatprep.subr.bf16.mxu0 %v2837_v23  ;;  %v932_v7 = vld [vmem:[#allocation6 + $0x438] sm:$0xff] }
 0x119   : > { %2191 = vset.pattern.permute.xlu1 %v2342_v54  ;;  %v2882_v54 = vpop.permute.xlu0 %542 }
 0x11a   : > { %562 = vperm.xlu1 %2191, %v2598_v39   ;;  %1142 = vmatprep.mubr.f32.mxu1 %v474_v45 }
 0x11c   : > { %v411_v22 = vpop.permute.xlu1 %410 }
 0x11d   : > { %v426_v58 = vmul.f32 %v411_v22, %v2875_v33  ;;  %v2888_v32 = vpop.permute.xlu0 %554  ;;  %v933_v22 = vld [vmem:[#allocation6 + $0x440] sm:$0xff] }
 0x11e   : > { %2192 = vset.pattern.permute.xlu1 %v2344_v60  ;;  %v363_v60 = vmul.f32 %v2764_v38, %v2724_v47  ;;  %v2906_v38 = vsel %vm380_vm0, %v378_v61, %v379_v9 }
 0x11f   : > { %514 = vperm.xlu1 %2192, %v2598_v39   ;;  %1143 = vmatmul.mubr.f32.gmra.mrb[10].mxu1 %v426_v58  ;;  %v934_v58 = vld [vmem:[#allocation6 + $0x448] sm:$0xff] }
 0x120   : > { %1147 = vmatprep.mubr.f32.mxu1 %v475_v57 }
 0x121   : > { %v350_v63 = vpop.permute.xlu1 %349  ;;  %v2899_v31 = vpop.permute.xlu0 %590 }
 0x122   : > { %v362_v0 = vmul.f32 %v350_v63, %v2841_v29 }
 0x123   : > { %2193 = vset.pattern.permute.xlu1 %v2343_v55  ;;  %v2897_v55 = vsel %vm380_vm0, %v377_v43, %v378_v61  ;;  %v931_v43 = vld [vmem:[#allocation6 + $0x430] sm:$0xff] }
 0x124   : > { %610 = vperm.xlu1 %2193, %v2598_v39   ;;  %1042 = vmatprep.mubr.f32.mxu0 %v362_v0  ;;  %v2037_v57 = vpack.c.bf16 %v932_v7, %v931_v43  ;;  %v935_v61 = vld [vmem:[#allocation6 + $0x450] sm:$0xff] }
 0x125   : > { %v2914_v20 = vpop.permute.xlu0 %602 }
 0x126   : > { %v301_v6 = vpop.permute.xlu1 %300 }
 0x127   : > { %v314_v26 = vmul.f32 %v301_v6, %v2856_v53 }
 0x128   : > { %2195 = vset.pattern.permute.xlu1 %v2345_v28 }
 0x129   : > { %694 = vperm.xlu1 %2195, %v2590_v27   ;;  %1043 = vmatmul.mubr.f32.gmra.mrb[12].mxu0 %v314_v26  ;;  %v428_v27 = vmul.f32 %v419_v41, %v2906_v38  ;;  %v487_v9 = vpop.permute.xlu0 %486  ;;  %v662_v41 = vmul.f32 %v2868_v50, %v2755_v56  ;;  %v2041_v50 = vpack.c.bf16 %v934_v58, %v933_v22 }
 0x12a   : > { %1047 = vmatprep.mubr.f32.mxu0 %v363_v60  ;;  %v517_v25 = vmul.f32 %v487_v9, %v2668_v4  ;;  %v936_v60 = vld [vmem:[#allocation6 + $0x458] sm:$0xff] }
 0x12b   : > { %v415_v39 = vpop.permute.xlu1 %414 }
 0x12c   : > { %v427_v14 = vmul.f32 %v415_v39, %v2897_v55  ;;  %v937_v39 = vld [vmem:[#allocation6 + $0x460] sm:$0xff] }
 0x12d   : > { %682 = vperm.xlu1 %2195, %v2560_v18  }
 0x12e   : > { %1148 = vmatmul.mubr.f32.gmra.mrb[12].mxu1 %v427_v14  ;;  %v938_v14 = vld [vmem:[#allocation6 + $0x468] sm:$0xff] }
 0x130   : > { %v467_v28 = vpop.permute.xlu1 %466 }
 0x131   : > { %v476_v19 = vmul.f32 %v467_v28, %v2738_v15  ;;  %686 = vperm.xlu1 %2195, %v2196_v3   ;;  %v940_v3 = vld [vmem:[#allocation6 + $0x478] sm:$0xff] }
 0x133   : > { %1152 = vmatprep.mubr.f32.mxu1 %v476_v19  ;;  %v939_v19 = vld [vmem:[#allocation6 + $0x470] sm:$0xff] }
 0x134   : > { %1153 = vmatmul.mubr.f32.gmra.mrb[14].mxu1 %v428_v27  ;;  %v2049_v27 = vpack.c.bf16 %v938_v14, %v937_v39 }
 0x135   : > { %690 = vperm.xlu1 %2195, %v2571_v44   ;;  %v306_v2 = vpop.permute.xlu1 %305  ;;  %v930_v44 = vld [vmem:[#allocation6 + $0x428] sm:$0xff] }
 0x136   : > { %v315_v18 = vmul.f32 %v306_v2, %v2865_v59  ;;  %v2033_v40 = vpack.c.bf16 %v930_v44, %v929_v46 }
 0x138   : > { %1048 = vmatmul.mubr.f32.gmra.mrb[14].mxu0 %v315_v18 }
 0x13a   : > { %v535_v13 = vpop.permute.xlu1 %534 }
 0x13b   : > { %v565_v30 = vmul.f32 %v535_v13, %v2776_v37 }
 0x13d   : > { %1222 = vmatprep.mubr.f32.mxu0 %v565_v30 }
 0x13e   : > { %1223 = vmatmul.mubr.f32.vlgmr.msra.gmra.mrb[16].mxu0 %v517_v25  ;;  %v499_v25 = vpop.permute.xlu0 %498 }
 0x13f   : > { %v631_v24 = vpop.permute.xlu1 %630  ;;  %2028 = vmatpush3.bf16.msra.mxu0 %v2837_v23 }
 0x140   : > { %v661_v36 = vmul.f32 %v631_v24, %v2702_v21  ;;  %2030 = vmatprep.subr.bf16.mxu0 %v2029_v17 }
 0x142   : > { %1327 = vmatprep.mubr.f32.mxu1 %v661_v36  ;;  %v511_v52 = vpop.permute.xlu0 %510 }
 0x143   : > { %2032 = vmatpush3.bf16.msra.mxu0 %v2029_v17  ;;  %v523_v58 = vmul.f32 %v511_v52, %v2724_v47 }
 0x144   : > { %v583_v42 = vpop.permute.xlu1 %582  ;;  %2034 = vmatprep.subr.bf16.mxu0 %v2033_v40 }
 0x145   : > { %v613_v45 = vmul.f32 %v583_v42, %v2714_v34  ;;  %v567_v34 = vmul.f32 %v2882_v54, %v2814_v35  ;;  %v615_v54 = vmul.f32 %v2899_v31, %v2783_v48  ;;  %v520_v48 = vmul.f32 %v499_v25, %v2752_v51 }
 0x146   : > { %v647_v24 = vpop.permute.xlu0 %646 }
 0x147   : > { %1328 = vmatmul.mubr.f32.vlgmr.msra.gmra.mrb[16].mxu1 %v613_v45  ;;  %2036 = vmatpush3.bf16.msra.mxu0 %v2033_v40  ;;  %v665_v46 = vmul.f32 %v647_v24, %v2841_v29 }
 0x148   : > { %1332 = vmatprep.mubr.f32.mxu1 %v662_v41  ;;  %2065 = vmatpush3.bf16.msra.mxu1 %v2837_v23  ;;  %v2045_v23 = vpack.c.bf16 %v936_v60, %v935_v61 }
 0x149   : > { %v539_v63 = vpop.permute.xlu1 %538  ;;  %2058 = vmatprep.subr.bf16.mxu1 %v2029_v17  ;;  %2038 = vmatprep.subr.bf16.mxu0 %v2037_v57 }
 0x14a   : > { %v566_v0 = vmul.f32 %v539_v63, %v2793_v62 }
 0x14b   : > { %2040 = vmatpush3.bf16.msra.mxu0 %v2037_v57 }
 0x14c   : > { %1227 = vmatprep.mubr.f32.mxu0 %v566_v0  ;;  %2066 = vmatpush3.bf16.msra.mxu1 %v2029_v17 }
 0x14d   : > { %2059 = vmatprep.subr.bf16.mxu1 %v2033_v40  ;;  %2042 = vmatprep.subr.bf16.mxu0 %v2041_v50 }
 0x14e   : > { %v491_v6 = vpop.permute.xlu1 %490 }
 0x14f   : > { %v518_v26 = vmul.f32 %v491_v6, %v2702_v21  ;;  %2044 = vmatpush3.bf16.msra.mxu0 %v2041_v50  ;;  %v2053_v21 = vpack.c.bf16 %v940_v3, %v939_v19 }
 0x150   : > { %2067 = vmatpush3.bf16.msra.mxu1 %v2033_v40  ;;  %2046 = vmatprep.subr.bf16.mxu0 %v2045_v23  ;;  %v570_v40 = vmul.f32 %v2888_v32, %v2897_v55 }
 0x151   : > { %1228 = vmatmul.mubr.f32.gmra.mrb[18].mxu0 %v518_v26  ;;  %2060 = vmatprep.subr.bf16.mxu1 %v2037_v57 }
 0x152   : > { %1232 = vmatprep.mubr.f32.mxu0 %v567_v34 }
 0x153   : > { %v587_v28 = vpop.permute.xlu1 %586  ;;  %2048 = vmatpush3.bf16.msra.mxu0 %v2045_v23 }
 0x154   : > { %v614_v2 = vmul.f32 %v587_v28, %v2789_v8  ;;  %2068 = vmatpush3.bf16.msra.mxu1 %v2037_v57  ;;  %2050 = vmatprep.subr.bf16.mxu0 %v2049_v27 }
 0x155   : > { %2061 = vmatprep.subr.bf16.mxu1 %v2041_v50 }
 0x156   : > { %1333 = vmatmul.mubr.f32.gmra.mrb[18].mxu1 %v614_v2 }
 0x157   : > { %2052 = vmatpush3.bf16.msra.mxu0 %v2049_v27 }
 0x158   : > { %v639_v18 = vpop.permute.xlu1 %638  ;;  %2069 = vmatpush3.bf16.msra.mxu1 %v2041_v50  ;;  %2054 = vmatprep.subr.bf16.mxu0 %v2053_v21 }
 0x159   : > { %v663_v9 = vmul.f32 %v639_v18, %v2752_v51  ;;  %2062 = vmatprep.subr.bf16.mxu1 %v2045_v23 }
 0x15b   : > { %1337 = vmatprep.mubr.f32.mxu1 %v663_v9  ;;  %2056 = vmatpush3.bf16.msra.mxu0 %v2053_v21 }
 0x15c   : > { %1338 = vmatmul.mubr.f32.gmra.mrb[20].mxu1 %v615_v54 }
 0x15d   : > { %v495_v13 = vpop.permute.xlu1 %494  ;;  %2070 = vmatpush3.bf16.msra.mxu1 %v2045_v23 }
 0x15e   : > { %v519_v8 = vmul.f32 %v495_v13, %v2755_v56  ;;  %2063 = vmatprep.subr.bf16.mxu1 %v2049_v27 }
 0x160   : > { %1233 = vmatmul.mubr.f32.gmra.mrb[20].mxu0 %v519_v8 }
 0x161   : > { %2071 = vmatpush3.bf16.msra.mxu1 %v2049_v27 }
 0x162   : > { %v547_v30 = vpop.permute.xlu1 %546  ;;  %2064 = vmatprep.subr.bf16.mxu1 %v2053_v21 }
 0x163   : > { %v568_v31 = vmul.f32 %v547_v30, %v2821_v49 }
 0x165   : > { %1237 = vmatprep.mubr.f32.mxu0 %v568_v31  ;;  %2072 = vmatpush3.bf16.msra.mxu1 %v2053_v21 }
 0x166   : > { %1238 = vmatmul.mubr.f32.gmra.mrb[22].mxu0 %v520_v48 }
 0x167   : > { %v643_v1 = vpop.permute.xlu1 %642 }
 0x168   : > { %v664_v17 = vmul.f32 %v643_v1, %v2798_v11 }
 0x16a   : > { %1342 = vmatprep.mubr.f32.mxu1 %v664_v17 }
 0x16c   : > { %v595_v56 = vpop.permute.xlu1 %594 }
 0x16d   : > { %v616_v44 = vmul.f32 %v595_v56, %v2829_v10  ;;  %v618_v10 = vmul.f32 %v2914_v20, %v2865_v59  ;;  %v659_v59 = vpop.permute.xlu0 %658 }
 0x16e   : > { %v668_v61 = vmul.f32 %v659_v59, %v2668_v4 }
 0x16f   : > { %1343 = vmatmul.mubr.f32.gmra.mrb[22].mxu1 %v616_v44 }
 0x170   : > { %1347 = vmatprep.mubr.f32.mxu1 %v665_v46 }
 0x171   : > { %v551_v51 = vpop.permute.xlu1 %550  ;;  %v679_v6 = vpop.permute.xlu0 %678 }
 0x172   : > { %v569_v36 = vmul.f32 %v551_v51, %v2875_v33  ;;  %v709_v23 = vmul.f32 %v679_v6, %v2793_v62 }
 0x174   : > { %1242 = vmatprep.mubr.f32.mxu0 %v569_v36 }
 0x175   : > { %v699_v14 = vpop.permute.xlu0 %698 }
 0x176   : > { %v503_v41 = vpop.permute.xlu1 %502 }
 0x177   : > { %v521_v42 = vmul.f32 %v503_v41, %v2798_v11 }
 0x179   : > { %1243 = vmatmul.mubr.f32.gmra.mrb[24].mxu0 %v521_v42  ;;  %v703_v28 = vpop.permute.xlu0 %702 }
 0x17a   : > { %1247 = vmatprep.mubr.f32.mxu0 %v570_v40  ;;  %v715_v2 = vmul.f32 %v703_v28, %v2698_v16 }
 0x17b   : > { %v599_v43 = vpop.permute.xlu1 %598 }
 0x17c   : > { %v617_v7 = vmul.f32 %v599_v43, %v2856_v53 }
 0x17d   : > { %v707_v21 = vpop.permute.xlu0 %706 }
 0x17e   : > { %1348 = vmatmul.mubr.f32.gmra.mrb[24].mxu1 %v617_v7  ;;  %v716_v54 = vmul.f32 %v707_v21, %v2776_v37 }
 0x180   : > { %v651_v45 = vpop.permute.xlu1 %650 }
 0x181   : > { %v666_v57 = vmul.f32 %v651_v45, %v2724_v47 }
 0x183   : > { %1352 = vmatprep.mubr.f32.mxu1 %v666_v57 }
 0x184   : > { %1353 = vmatmul.mubr.f32.gmra.mrb[26].mxu1 %v618_v10 }
 0x185   : > { %v507_v22 = vpop.permute.xlu1 %506 }
 0x186   : > { %v522_v32 = vmul.f32 %v507_v22, %v2841_v29 }
 0x188   : > { %1248 = vmatmul.mubr.f32.gmra.mrb[26].mxu0 %v522_v32 }
 0x18a   : > { %v559_v63 = vpop.permute.xlu1 %558 }
 0x18b   : > { %v571_v0 = vmul.f32 %v559_v63, %v2906_v38 }
 0x18d   : > { %1252 = vmatprep.mubr.f32.mxu0 %v571_v0 }
 0x18e   : > { %1253 = vmatmul.mubr.f32.gmra.mrb[28].mxu0 %v523_v58 }
 0x18f   : > { %v655_v53 = vpop.permute.xlu1 %654 }
 0x190   : > { %v667_v50 = vmul.f32 %v655_v53, %v2673_v5 }
 0x192   : > { %1357 = vmatprep.mubr.f32.mxu1 %v667_v50 }
 0x194   : > { %v607_v20 = vpop.permute.xlu1 %606 }
 0x195   : > { %v619_v60 = vmul.f32 %v607_v20, %v2738_v15  ;;  %v714_v15 = vmul.f32 %v699_v14, %v2906_v38 }
 0x197   : > { %1358 = vmatmul.mubr.f32.gmra.mrb[28].mxu1 %v619_v60 }
 0x198   : > { %1362 = vmatprep.mubr.f32.mxu1 %v668_v61 }
 0x199   : > { %v563_v34 = vpop.permute.xlu1 %562 }
 0x19a   : > { %v572_v47 = vmul.f32 %v563_v34, %v2698_v16 }
 0x19c   : > { %1257 = vmatprep.mubr.f32.mxu0 %v572_v47 }
 0x19e   : > { %v515_v26 = vpop.permute.xlu1 %514 }
 0x19f   : > { %v524_v39 = vmul.f32 %v515_v26, %v2673_v5 }
 0x1a1   : > { %1258 = vmatmul.mubr.f32.gmra.mrb[30].mxu0 %v524_v39 }
 0x1a2   : > { %1885 = vmatprep.mubr.f32.mxu0 %v709_v23 }
 0x1a3   : > { %v611_v27 = vpop.permute.xlu1 %610 }
 0x1a4   : > { %v620_v4 = vmul.f32 %v611_v27, %v2690_v12 }
 0x1a6   : > { %1363 = vmatmul.mubr.f32.gmra.mrb[30].mxu1 %v620_v4 }
 0x1a8   : > { %v695_v19 = vpop.permute.xlu1 %694 }
 0x1a9   : > { %v713_v3 = vmul.f32 %v695_v19, %v2897_v55 }
 0x1ab   : > { %1891 = vmatprep.mubr.f32.mxu1 %v713_v3 }
 0x1ac   : > { %v683_v62 = vpop.permute.xlu1 %682  ;;  %1892 = vmatmul.mubr.f32.vlgmr.msra.gmra.mrb[32].mxu1 %v714_v15 }
 0x1ad   : > { %v710_v5 = vmul.f32 %v683_v62, %v2814_v35  ;;  %1894 = vmatprep.mubr.f32.mxu1 %v715_v2  ;;  %v1597_v35 = vld [vmem:[%s3054_s3] ss:$0 sm:$0xff] }
 0x1af   : > { %1886 = vmatmul.mubr.f32.vlgmr.msra.gmra.mrb[32].mxu0 %v710_v5 }
 0x1b0   : > { %v687_v12 = vpop.permute.xlu1 %686  ;;  %1895 = vmatmul.mubr.f32.gmra.mrb[34].mxu1 %v716_v54 }
 0x1b1   : > { %v711_v18 = vmul.f32 %v687_v12, %v2821_v49 }
 0x1b3   : > { %1888 = vmatprep.mubr.f32.mxu0 %v711_v18 }
 0x1b4   : > { %v691_v38 = vpop.permute.xlu1 %690 }
 0x1b5   : > { %v712_v55 = vmul.f32 %v691_v38, %v2875_v33 }
 0x1b6   : > { %v1693_v9 = vpop.f32.mrb[0].mxu1 }
 0x1b7   : > { %v1694_v16 = vpop.f32.mrb[1].mxu1  ;;  %1889 = vmatmul.mubr.f32.gmra.mrb[34].mxu0 %v712_v55 }
 0x1b8   : > { %v1695_v13 = vadd.f32 %v1694_v16, %v1693_v9 }
 0x1c7   : > { %v1637_v8 = vpop.f32.mrb[0].mxu0 }
 0x1c8   : > { %v1638_v25 = vpop.f32.mrb[1].mxu0 }
 0x1c9   : > { %v1639_v37 = vadd.f32 %v1638_v25, %v1637_v8 }
 0x1cb   : > { %v1015_v30 = vadd.f32 %v1639_v37, %v1597_v35  ;;  %v1640_v48 = vpop.f32.mrb[2].mxu0 }
 0x1cc   : > { %v1641_v31 = vpop.f32.mrb[3].mxu0 }
 0x1cd   : > { %v1642_v52 = vadd.f32 %v1641_v31, %v1640_v48  ;;  %v1120_v49 = vadd.f32 %v1695_v13, %v1015_v30 }
 0x1cf   : > { %v1643_v1 = vpop.f32.mrb[4].mxu0  ;;  %v1020_v44 = vadd.f32 %v1642_v52, %v1597_v35 }
 0x1d0   : > { %v1644_v17 = vpop.f32.mrb[5].mxu0 }
 0x1d1   : > { %v1645_v24 = vadd.f32 %v1644_v17, %v1643_v1 }
 0x1d3   : > { %v1696_v33 = vpop.f32.mrb[2].mxu1  ;;  %v1025_v41 = vadd.f32 %v1645_v24, %v1597_v35 }
 0x1d4   : > { %v1646_v56 = vpop.f32.mrb[6].mxu0  ;;  %v1697_v46 = vpop.f32.mrb[3].mxu1 }
 0x1d5   : > { %v1698_v51 = vadd.f32 %v1697_v46, %v1696_v33  ;;  %v1647_v36 = vpop.f32.mrb[7].mxu0 }
 0x1d6   : > { %v1648_v40 = vadd.f32 %v1647_v36, %v1646_v56 }
 0x1d7   : > { %v1125_v42 = vadd.f32 %v1698_v51, %v1020_v44  ;;  %v1699_v43 = vpop.f32.mrb[4].mxu1 }
 0x1d8   : > { %v1700_v7 = vpop.f32.mrb[5].mxu1  ;;  %v1030_v32 = vadd.f32 %v1648_v40, %v1597_v35 }
 0x1d9   : > { %v1701_v10 = vadd.f32 %v1700_v7, %v1699_v43 }
 0x1db   : > { %v1130_v45 = vadd.f32 %v1701_v10, %v1025_v41  ;;  %v1702_v57 = vpop.f32.mrb[6].mxu1 }
 0x1dc   : > { %v1703_v22 = vpop.f32.mrb[7].mxu1 }
 0x1dd   : > { %v1704_v58 = vadd.f32 %v1703_v22, %v1702_v57 }
 0x1df   : > { %v1135_v63 = vadd.f32 %v1704_v58, %v1030_v32  ;;  %v1705_v0 = vpop.f32.mrb[8].mxu1 }
 0x1e0   : > { %v1706_v53 = vpop.f32.mrb[9].mxu1 }
 0x1e1   : > { %v1707_v50 = vadd.f32 %v1706_v53, %v1705_v0 }
 0x1e3   : > { %v1649_v59 = vpop.f32.mrb[8].mxu0 }
 0x1e4   : > { %v1650_v20 = vpop.f32.mrb[9].mxu0 }
 0x1e5   : > { %v1651_v61 = vadd.f32 %v1650_v20, %v1649_v59 }
 0x1e7   : > { %v1035_v60 = vadd.f32 %v1651_v61, %v1597_v35 }
 0x1e9   : > { %v1140_v34 = vadd.f32 %v1707_v50, %v1035_v60  ;;  %v1652_v6 = vpop.f32.mrb[10].mxu0 }
 0x1ea   : > { %v1653_v47 = vpop.f32.mrb[11].mxu0 }
 0x1eb   : > { %v1654_v23 = vadd.f32 %v1653_v47, %v1652_v6 }
 0x1ed   : > { %v1040_v26 = vadd.f32 %v1654_v23, %v1597_v35 }
 0x1f2   : > { %v1708_v39 = vpop.f32.mrb[10].mxu1 }
 0x1f3   : > { %v1709_v14 = vpop.f32.mrb[11].mxu1 }
 0x1f4   : > { %v1710_v27 = vadd.f32 %v1709_v14, %v1708_v39 }
 0x1f6   : > { %v2968_v4 = vadd.f32 %v1710_v27, %v1040_v26 }
 0x1fc   : > { %v1655_v28 = vpop.f32.mrb[12].mxu0 }
 0x1fd   : > { %v1656_v15 = vpop.f32.mrb[13].mxu0 }
 0x1fe   : > { %v1657_v19 = vadd.f32 %v1656_v15, %v1655_v28 }
 0x200   : > { %v1045_v21 = vadd.f32 %v1657_v19, %v1597_v35 }
 0x201   : > { %v1711_v3 = vpop.f32.mrb[12].mxu1 }
 0x202   : > { %v1712_v2 = vpop.f32.mrb[13].mxu1 }
 0x203   : > { %v1713_v62 = vadd.f32 %v1712_v2, %v1711_v3 }
 0x205   : > { %v1150_v5 = vadd.f32 %v1713_v62, %v1045_v21 }
 0x207   : > { %v1714_v54 = vpop.f32.mrb[14].mxu1 }
 0x208   : > { %v1715_v12 = vpop.f32.mrb[15].mxu1 }
 0x209   : > { %v1716_v18 = vadd.f32 %v1715_v12, %v1714_v54 }
 0x20b   : > { %v1658_v38 = vpop.f32.mrb[14].mxu0 }
 0x20c   : > { %v1659_v55 = vpop.f32.mrb[15].mxu0 }
 0x20d   : > { %v1660_v9 = vadd.f32 %v1659_v55, %v1658_v38 }
 0x20f   : > { %v1050_v16 = vadd.f32 %v1660_v9, %v1597_v35 }
 0x211   : > { %v1155_v13 = vadd.f32 %v1716_v18, %v1050_v16  ;;  %v1749_v8 = vpop.f32.mrb[16].mxu0 }
 0x212   : > { %v1750_v25 = vpop.f32.mrb[17].mxu0 }
 0x213   : > { %v1751_v37 = vadd.f32 %v1750_v25, %v1749_v8 }
 0x215   : > { %v1225_v30 = vadd.f32 %v1751_v37, %v1120_v49 }
 0x21a   : > { %v1805_v48 = vpop.f32.mrb[16].mxu1 }
 0x21b   : > { %v1806_v31 = vpop.f32.mrb[17].mxu1 }
 0x21c   : > { %v1807_v52 = vadd.f32 %v1806_v31, %v1805_v48 }
 0x21e   : > { %v2970_v1 = vadd.f32 %v1807_v52, %v1225_v30 }
 0x224   : > { %v1752_v17 = vpop.f32.mrb[18].mxu0 }
 0x225   : > { %v1753_v24 = vpop.f32.mrb[19].mxu0 }
 0x226   : > { %v1754_v33 = vadd.f32 %v1753_v24, %v1752_v17 }
 0x228   : > { %v1230_v56 = vadd.f32 %v1754_v33, %v1125_v42 }
 0x229   : > { %v1808_v46 = vpop.f32.mrb[18].mxu1 }
 0x22a   : > { %v1809_v44 = vpop.f32.mrb[19].mxu1 }
 0x22b   : > { %v1810_v51 = vadd.f32 %v1809_v44, %v1808_v46 }
 0x22d   : > { %v1335_v36 = vadd.f32 %v1810_v51, %v1230_v56 }
 0x22f   : > { %v1811_v40 = vpop.f32.mrb[20].mxu1 }
 0x230   : > { %v1812_v35 = vpop.f32.mrb[21].mxu1 }
 0x231   : > { %v1813_v41 = vadd.f32 %v1812_v35, %v1811_v40  ;;  %v2198_v35 = vld [vmem:[%s2525_s29] sm:$0xff] }
 0x233   : > { %v1755_v43 = vpop.f32.mrb[20].mxu0 }
 0x234   : > { %v1756_v7 = vpop.f32.mrb[21].mxu0 }
 0x235   : > { %v1757_v10 = vadd.f32 %v1756_v7, %v1755_v43  ;;  %v2199_v43 = vld [vmem:[%s2525_s29 + $0x38] sm:$0xff] }
 0x237   : > { %v1235_v49 = vadd.f32 %v1757_v10, %v1130_v45  ;;  %v2200_v10 = vld [vmem:[%s2525_s29 + $0x30] sm:$0xff] }
 0x239   : > { %v1758_v57 = vpop.f32.mrb[22].mxu0  ;;  %v2972_v22 = vadd.f32 %v1813_v41, %v1235_v49 }
 0x23a   : > { %v1759_v32 = vpop.f32.mrb[23].mxu0 }
 0x23b   : > { %v1760_v58 = vadd.f32 %v1759_v32, %v1758_v57 }
 0x23d   : > { %v1240_v0 = vadd.f32 %v1760_v58, %v1135_v63 }
 0x242   : > { %v1814_v53 = vpop.f32.mrb[22].mxu1 }
 0x243   : > { %v1815_v50 = vpop.f32.mrb[23].mxu1 }
 0x244   : > { %v1816_v42 = vadd.f32 %v1815_v50, %v1814_v53  ;;  %v2202_v50 = vld [vmem:[%s2525_s29 + $0x10] sm:$0xff] }
 0x246   : > { %v2974_v59 = vadd.f32 %v1816_v42, %v1240_v0  ;;  %v2201_v0 = vld [vmem:[%s2525_s29 + $0x18] sm:$0xff] }
 0x24c   : > { %v1761_v20 = vpop.f32.mrb[24].mxu0 }
 0x24d   : > { %v1762_v61 = vpop.f32.mrb[25].mxu0 }
 0x24e   : > { %v1763_v60 = vadd.f32 %v1762_v61, %v1761_v20 }
 0x250   : > { %v1245_v6 = vadd.f32 %v1763_v60, %v1140_v34 }
 0x251   : > { %v1817_v47 = vpop.f32.mrb[24].mxu1 }
 0x252   : > { %v1818_v23 = vpop.f32.mrb[25].mxu1 }
 0x253   : > { %v1819_v26 = vadd.f32 %v1818_v23, %v1817_v47 }
 0x255   : > { %v1350_v39 = vadd.f32 %v1819_v26, %v1245_v6 }
 0x257   : > { %v1820_v45 = vpop.f32.mrb[26].mxu1 }
 0x258   : > { %v1821_v14 = vpop.f32.mrb[27].mxu1 }
 0x259   : > { %v1822_v27 = vadd.f32 %v1821_v14, %v1820_v45 }
 0x25b   : > { %v1764_v28 = vpop.f32.mrb[26].mxu0 }
 0x25c   : > { %v1765_v15 = vpop.f32.mrb[27].mxu0 }
 0x25d   : > { %v1766_v19 = vadd.f32 %v1765_v15, %v1764_v28 }
 0x25f   : > { %v1250_v63 = vadd.f32 %v1766_v19, %v2968_v4 }
 0x261   : > { %v1767_v3 = vpop.f32.mrb[28].mxu0  ;;  %v1355_v2 = vadd.f32 %v1822_v27, %v1250_v63 }
 0x262   : > { %v1768_v21 = vpop.f32.mrb[29].mxu0 }
 0x263   : > { %v1769_v62 = vadd.f32 %v1768_v21, %v1767_v3 }
 0x265   : > { %v1255_v54 = vadd.f32 %v1769_v62, %v1150_v5 }
 0x26a   : > { %v1823_v12 = vpop.f32.mrb[28].mxu1 }
 0x26b   : > { %v1824_v18 = vpop.f32.mrb[29].mxu1 }
 0x26c   : > { %v1825_v34 = vadd.f32 %v1824_v18, %v1823_v12 }
 0x26e   : > { %v1360_v38 = vadd.f32 %v1825_v34, %v1255_v54 }
 0x274   : > { %v1770_v55 = vpop.f32.mrb[30].mxu0 }
 0x275   : > { %v1771_v9 = vpop.f32.mrb[31].mxu0 }
 0x276   : > { %v1772_v16 = vadd.f32 %v1771_v9, %v1770_v55 }
 0x278   : > { %v1260_v8 = vadd.f32 %v1772_v16, %v1155_v13 }
 0x279   : > { %v1826_v25 = vpop.f32.mrb[30].mxu1 }
 0x27a   : > { %v1827_v37 = vpop.f32.mrb[31].mxu1 }
 0x27b   : > { %v1828_v30 = vadd.f32 %v1827_v37, %v1826_v25 }
 0x27d   : > { %v1365_v48 = vadd.f32 %v1828_v30, %v1260_v8 }
 0x27f   : > { %v1893_v31 = vpop.f32.mrb[32].mxu1 }
 0x280   : > { %v1460_v4 = vadd.f32 %v1893_v31, %v1355_v2  ;;  %v1454_v52 = vpop.f32.mrb[33].mxu1 }
 0x281   : > { %v1455_v17 = vadd.f32 %v1454_v52, %v1350_v39 }
 0x282   : > { %v1478_v5 = vadd.f32 %v1460_v4, %v2841_v29  ;;  %v1887_v24 = vpop.f32.mrb[32].mxu0 }
 0x283   : > { %v1477_v33 = vadd.f32 %v1455_v17, %v2798_v11  ;;  %v1440_v56 = vadd.f32 %v1887_v24, %v1335_v36  ;;  %v1434_v46 = vpop.f32.mrb[33].mxu0  ;;  %v1896_v13 = vpop.f32.mrb[34].mxu1  ;;  %v2197_v11 = vld [vmem:[%s2525_s29 + $0x8] sm:$0xff] }
 0x284   : > { %1486 = vst [vmem:[%s2981_s10 + $0x28] sm:$0xff] %v1478_v5  ;;  %v1435_v44 = vadd.f32 %v1434_v46, %v2970_v1  ;;  %v1470_v29 = vadd.f32 %v1896_v13, %v1365_v48  ;;  %v1464_v51 = vpop.f32.mrb[35].mxu1 }
 0x285   : > { %1485 = vst [vmem:[%s2981_s10 + $0x20] sm:$0xff] %v1477_v33  ;;  %v1474_v36 = vadd.f32 %v2197_v11, %v1440_v56  ;;  %v1465_v40 = vadd.f32 %v1464_v51, %v1360_v38 }
 0x286   : > { %v1473_v41 = vadd.f32 %v2198_v35, %v1435_v44  ;;  %v1480_v7 = vadd.f32 %v2199_v43, %v1470_v29 }
 0x287   : > { %1482 = vst [vmem:[%s2981_s10 + $0x8] sm:$0xff] %v1474_v36  ;;  %v1479_v49 = vadd.f32 %v2200_v10, %v1465_v40 }
 0x288   : > { %1481 = vst [vmem:[%s2981_s10] sm:$0xff] %v1473_v41  ;;  %1488 = vst [vmem:[%s2981_s10 + $0x38] sm:$0xff] %v1480_v7 }
 0x289   : > { %1487 = vst [vmem:[%s2981_s10 + $0x30] sm:$0xff] %v1479_v49 }
 0x28a   : > { %v1890_v1 = vpop.f32.mrb[34].mxu0 }
 0x28b   : > { %v1450_v57 = vadd.f32 %v1890_v1, %v2974_v59  ;;  %v1444_v32 = vpop.f32.mrb[35].mxu0 }
 0x28c   : > { %v1445_v58 = vadd.f32 %v1444_v32, %v2972_v22 }
 0x28d   : > { %v1476_v53 = vadd.f32 %v2201_v0, %v1450_v57 }
 0x28e   : > { %v1475_v42 = vadd.f32 %v2202_v50, %v1445_v58 }
 0x28f   : > { %1484 = vst [vmem:[%s2981_s10 + $0x18] sm:$0xff] %v1476_v53 }
 0x290   : > { %1483 = vst [vmem:[%s2981_s10 + $0x10] sm:$0xff] %v1475_v42 }
 0x291   : > { %2274 = shalt.err (!%p2271_p7)
}
 0x292   : > { %s2275_s29 = scalar_lea.hbm %s3004_s8, 1024  ;;  %s2279_s9 = scalar_lea.hbm %s3055_s4, 2048 }
 0x293   : > { %p2276_p9 = scmp.ne.s32.totalorder %s3004_s8, %s2275_s29  ;;  %p2280_p5 = scmp.lt.u32.totalorder %s3004_s8, %s3055_s4 }
 0x294   : > { %p2281_p11 = scmp.lt.u32.totalorder %s2279_s9, %s2275_s29  ;;  %p2283_p4 = scmp.lt.u32.totalorder %s2275_s29, %s3004_s8 }
 0x295   : > { %p2277_p1 = pnand %p2276_p9, %p2468_p12 }
 0x296   : > { %p2282_p2 = por %p2281_p11, %p2280_p5 }
 0x297   : > { %p2278_p0 = pneg %p2277_p1 }
 0x298   : > { %p2284_p6 = por %p2283_p4, %p2282_p2 }
 0x29a   : > { %p2285_p8 = pnand %p2284_p6, %p2278_p0 }
 0x29c   : > { %2288 = shalt.err (!%p2285_p8)
}
 0x29d   : > { %s2347_s10 = smov 128   ;;  %s2348_s6 = smov 8  }
 0x29e   : > { %2079 = dma.vmem_to_hbm [thread:$0]  (%p2468_p12), %s2997_s20, 1024, %s3004_s8, %s1490_s19, %s2347_s10, %s2347_s10, %s2348_s6  }
 0x29f PF: > { %s1518_s7 = sand.u32 1, %s2319_s15   ;;  %p3070_p10 = scmp.ne.s32.totalorder %s3060_s22, 0 }
 0x2a0   : > { %p3071_p13 = scmp.ge.s32.totalorder %s2331_s18, 2  ;;  %s1519_s26 = scalar_lea.sflag [#allocation5], %s1518_s7 }
 0x2a2   : > { %p2090_p3 = pnand %p3071_p13, %p3070_p10 }
 0x2a4   : > { %2314 = dma.done.wait (!%p2090_p3), %s1519_s26, 1024  }
 0x2a5   : > { %2316 = vsyncadd (!%p2090_p3), %s1519_s26, 4294966272  ;;  %p18_p7 = scmp.ge.s32.totalorder %s2430_s27, 4   ;;  %s3072_s15 = smov %s2323_s16 }
 0x2a6   : > { %s3073_s16 = smov %s2327_s17  ;;  %s3074_s17 = smov %s2464_s24 }
 0x2a7   : > { %s3075_s18 = smov %s2430_s27  ;;  %20 = sbr.rel (!%p18_p7) target bundleno = 6 (0x6), region = 85 }
 0x2ae   :  { %1524 = vsyncpa [#allocation4], 1 }
 0x2af   :  { %1526 = vsyncpa [#allocation4 + $0x1], 1 }
 0x2b0   :  { %1527 = vsyncpa [#allocation7], 1 }
 0x2b1   :  { %1528 = vsyncpa [#allocation5], 1 }
 0x2b2   :  { %1530 = vsyncpa [#allocation5 + $0x1], 1 }

</bundles_post_ra>
